<compile_context>
chip_gen: v7x
topology: tpu7x:2x2x1
jax: 0.10.0
libtpu: 0.0.40
codegen_flags: <defaults>
</compile_context>

<pallas_src>
import functools

import jax
import jax.numpy as jnp
from jax import lax
from jax.experimental import pallas as pl
from jax.experimental.pallas import tpu as pltpu


# -----------------------------------------------------------------------------
# helpers: VMEM budget & strip-size selection
# -----------------------------------------------------------------------------
def _largest_divisor_leq(n, cap):
    cap = max(1, min(n, cap))
    for d in range(cap, 0, -1):
        if n % d == 0:
            return d
    return 1


def _default_vmem_limit_bytes():
    # Generation-aware: 128 MiB on v5e/v6e, 64 MiB/TensorCore on v7x.
    try:
        cap = int(pltpu.get_tpu_info().vmem_capacity_bytes)
    except Exception:
        cap = 64 * 1024 * 1024  # conservative (v7x per-TC VMEM)
    return min(int(cap * 0.85), 112 * 1024 * 1024)


def _choose_row_tile(H, W, Cin, Cmid, Coutp, x_bytes, c_bytes, o_bytes,
                     budget_bytes, row_tile=None):
    """Largest row strip whose per-step working set fits the VMEM budget."""
    if row_tile is not None:                 # explicit override (testing)
        return _largest_divisor_leq(H, row_tile)

    weight_bytes = 2 * (Cin * Cmid + 9 * Cmid * Coutp) * c_bytes  # 2x buffered

    def footprint(th):
        return (2 * th * W * Cin * x_bytes          # x block, double buffered
                + 2 * th * W * Coutp * o_bytes      # out block, double buffered
                + (th + 2) * (W + 2) * Cmid * c_bytes   # activation scratch
                + th * W * Coutp * 4                # f32 accumulator scratch
                + 2 * W * Cin * x_bytes             # halo buffer
                + weight_bytes)

    divisors = [d for d in range(H, 0, -1) if H % d == 0]
    fitting = [d for d in divisors if footprint(d) <= budget_bytes]
    if not fitting:
        return 1                              # degenerate but correct
    aligned = [d for d in fitting if d % 8 == 0 or d == H]
    return aligned[0] if aligned else fitting[0]


# -----------------------------------------------------------------------------
# Fused kernel: BN1+ReLU+1x1conv (BN2 scale folded) + b2+ReLU -> VMEM scratch
#               -> 3x3 conv (pad=1) over one (batch, row-strip) tile.
#
# refs (order; `has_halo` is a Python flag baked in via functools.partial):
#   x_ref   : (TH, W, Cin)            row strip of x (native dtype)
#   x_hbm   : (N*H, W, Cin)  [halo]   same x left in HBM for 2 halo-row DMAs
#   s1_ref  : (1, Cin)   f32          gamma1 / sqrt(var1+eps)
#   b1_ref  : (1, Cin)   f32          beta1 - mean1*s1
#   w1_ref  : (Cin, Cmid)             conv1 weight with BN2 scale folded in
#   b2_ref  : (1, Cmid)  f32          beta2 - mean2*s2
#   w2_ref  : (3, 3, Cmid, Coutp)     conv2 weight, Cout zero-padded to Coutp
#   o_ref   : (1, TH, W, Coutp)
# scratch:
#   acc_ref : (TH*W, Coutp) f32       3x3-conv accumulator (kept out of vregs)
#   act_ref : (TH+2, W+2, Cmid)       zero-bordered bottleneck activation
#   halo_ref: (2, W, Cin)    [halo]   row above / below this strip
#   sem     : DMA sems (2,)  [halo]
# -----------------------------------------------------------------------------
def _dense_layer_kernel(*refs, has_halo):
    if has_halo:
        (x_ref, x_hbm, s1_ref, b1_ref, w1_ref, b2_ref, w2_ref,
         o_ref, acc_ref, act_ref, halo_ref, sem) = refs
    else:
        (x_ref, s1_ref, b1_ref, w1_ref, b2_ref, w2_ref,
         o_ref, acc_ref, act_ref) = refs

    TH, W, Cin = x_ref.shape
    Cmid = w1_ref.shape[1]
    Coutp = o_ref.shape[-1]
    cdtype = act_ref.dtype

    if has_halo:
        # kick off the tiny halo-row DMAs; they overlap the main matmul
        n = pl.program_id(0)
        t = pl.program_id(1)
        nT = pl.num_programs(1)
        H = nT * TH
        base = n * H
        top_src = base + jnp.maximum(t * TH - 1, 0)        # clamped into image
        bot_src = base + jnp.minimum((t + 1) * TH, H - 1)
        top_cp = pltpu.make_async_copy(x_hbm.at[pl.ds(top_src, 1)],
                                       halo_ref.at[pl.ds(0, 1)], sem.at[0])
        bot_cp = pltpu.make_async_copy(x_hbm.at[pl.ds(bot_src, 1)],
                                       halo_ref.at[pl.ds(1, 1)], sem.at[1])
        top_cp.start()
        bot_cp.start()

    s1 = s1_ref[...]
    b1 = b1_ref[...]
    b2 = b2_ref[...]
    w1 = w1_ref[...]

    def bottleneck_act(x2d):
        # BN1 -> ReLU -> 1x1 conv (BN2 scale already in w1) -> +b2 -> ReLU
        a = jnp.maximum(x2d.astype(jnp.float32) * s1 + b1, 0.0)
        z = jnp.dot(a.astype(cdtype), w1, preferred_element_type=jnp.float32)
        return jnp.maximum(z + b2, 0.0)

    # ---- main TH rows -> interior of the zero-bordered activation scratch --
    act_main = bottleneck_act(x_ref[...].reshape(TH * W, Cin))
    act_ref[1:TH + 1, 1:W + 1, :] = act_main.astype(cdtype).reshape(TH, W, Cmid)

    # zero left/right padding columns (rewritten every step: megacore-safe)
    zcol = jnp.zeros((TH + 2, 1, Cmid), cdtype)
    act_ref[:, 0:1, :] = zcol
    act_ref[:, W + 1:W + 2, :] = zcol

    # ---- halo rows (exact zeros at the image borders) -----------------------
    if has_halo:
        top_cp.wait()
        bot_cp.wait()
        act_h = bottleneck_act(halo_ref[...].reshape(2 * W, Cin))
        act_h = act_h.reshape(2, W, Cmid)
        top = jnp.where(t > 0, act_h[0], 0.0)          # where: NaN/Inf-safe
        bot = jnp.where(t < nT - 1, act_h[1], 0.0)
        act_ref[0:1, 1:W + 1, :] = top.astype(cdtype).reshape(1, W, Cmid)
        act_ref[TH + 1:TH + 2, 1:W + 1, :] = bot.astype(cdtype).reshape(1, W, Cmid)
    else:
        zrow = jnp.zeros((1, W, Cmid), cdtype)
        act_ref[0:1, 1:W + 1, :] = zrow
        act_ref[TH + 1:TH + 2, 1:W + 1, :] = zrow

    # ---- 3x3 conv: 9 MXU matmuls (K = Cmid each) into a VMEM accumulator ---
    first = True
    for dh in range(3):
        for dw in range(3):
            tap = act_ref[dh:dh + TH, dw:dw + W, :].reshape(TH * W, Cmid)
            contrib = jnp.dot(tap, w2_ref[dh, dw],
                              preferred_element_type=jnp.float32)
            if first:
                acc_ref[...] = contrib
                first = False
            else:
                acc_ref[...] += contrib

    o_ref[...] = acc_ref[...].reshape(1, TH, W, Coutp).astype(o_ref.dtype)


# -----------------------------------------------------------------------------
# NHWC wrapper (preferred entry point: a full DenseNet should stay NHWC and,
# ideally, keep the lane-padded Coutp layout with slice_output=False).
# -----------------------------------------------------------------------------
def dense_layer_forward_nhwc(x_nhwc, params, *, eps=1e-5,
                             compute_dtype=jnp.float32, out_dtype=None,
                             row_tile=None, vmem_limit_bytes=None,
                             slice_output=True):
    N, H, W, Cin = x_nhwc.shape
    w1 = params["w1"]                        # (Cin, Cmid)
    w2 = params["w2"]                        # (3, 3, Cmid, Cout)  HWIO
    Cmid = w1.shape[1]
    Cout = w2.shape[-1]
    Coutp = ((Cout + 127) // 128) * 128      # lane-dense output width
    cdtype = jnp.dtype(compute_dtype)
    odtype = jnp.dtype(out_dtype) if out_dtype is not None else x_nhwc.dtype

    # fold BatchNorms (inference mode) into scale/bias
    s1 = params["gamma1"] / jnp.sqrt(params["var1"] + eps)
    b1 = params["beta1"] - params["mean1"] * s1
    s2 = params["gamma2"] / jnp.sqrt(params["var2"] + eps)
    b2 = params["beta2"] - params["mean2"] * s2

    # fold BN2 scale into the (linear) 1x1 conv weight
    w1f = (w1 * s2[None, :]).astype(cdtype)

    # conv2 weight: pad Cout -> Coutp (lane dense); keep per-tap layout
    w2p = jnp.pad(w2, ((0, 0), (0, 0), (0, 0), (0, Coutp - Cout))).astype(cdtype)

    # generation-aware VMEM sizing -> strip size TH
    if vmem_limit_bytes is None:
        vmem_limit_bytes = _default_vmem_limit_bytes()
    vmem_limit_bytes = int(vmem_limit_bytes)
    budget = int(vmem_limit_bytes * 0.6)     # headroom for compiler scratch
    xb = jnp.dtype(x_nhwc.dtype).itemsize
    cb = cdtype.itemsize
    ob = odtype.itemsize
    TH = _choose_row_tile(H, W, Cin, Cmid, Coutp, xb, cb, ob, budget, row_tile)
    nT = H // TH
    has_halo = nT > 1

    # no wrapper-side astype HBM pass: feed x at native dtype, cast in kernel
    x_flat = x_nhwc.reshape(N * H, W, Cin)

    kernel = functools.partial(_dense_layer_kernel, has_halo=has_halo)

    in_specs = [pl.BlockSpec((TH, W, Cin),
                             lambda n, t, _nT=nT: (n * _nT + t, 0, 0))]
    operands = [x_flat]
    if has_halo:
        # NOTE: x_flat is passed twice (pipelined input + pl.ANY halo source);
        # do not donate/alias this operand.
        in_specs.append(pl.BlockSpec(memory_space=pl.ANY))
        operands.append(x_flat)
    in_specs += [
        pl.BlockSpec((1, Cin), lambda n, t: (0, 0)),
        pl.BlockSpec((1, Cin), lambda n, t: (0, 0)),
        pl.BlockSpec((Cin, Cmid), lambda n, t: (0, 0)),
        pl.BlockSpec((1, Cmid), lambda n, t: (0, 0)),
        pl.BlockSpec((3, 3, Cmid, Coutp), lambda n, t: (0, 0, 0, 0)),
    ]
    operands += [
        s1.reshape(1, Cin).astype(jnp.float32),
        b1.reshape(1, Cin).astype(jnp.float32),
        w1f,
        b2.reshape(1, Cmid).astype(jnp.float32),
        w2p,
    ]

    scratch_shapes = [
        pltpu.VMEM((TH * W, Coutp), jnp.float32),        # conv2 accumulator
        pltpu.VMEM((TH + 2, W + 2, Cmid), cdtype),       # activation scratch
    ]
    if has_halo:
        scratch_shapes += [
            pltpu.VMEM((2, W, Cin), x_nhwc.dtype),       # halo rows (x dtype)
            pltpu.SemaphoreType.DMA((2,)),
        ]

    out = pl.pallas_call(
        kernel,
        out_shape=jax.ShapeDtypeStruct((N, H, W, Coutp), odtype),
        grid_spec=pltpu.PrefetchScalarGridSpec(
            num_scalar_prefetch=0,
            grid=(N, nT),
            in_specs=in_specs,
            out_specs=pl.BlockSpec((1, TH, W, Coutp),
                                   lambda n, t: (n, t, 0, 0)),
            scratch_shapes=scratch_shapes),
        compiler_params=pltpu.CompilerParams(
            dimension_semantics=("parallel", "parallel"),
            vmem_limit_bytes=vmem_limit_bytes),
    )(*operands)

    # TODO(synk): drop_rate > 0 (training dropout) not implemented; identity.
    if slice_output:
        return out[..., :Cout]
    return out                                # lane-padded Coutp layout


# -----------------------------------------------------------------------------
# PyTorch-compatible wrapper: NCHW in, NCHW out.  Accepts a Tensor or a list of
# Tensors (DenseNet concatenates previous features along channels).
# NOTE: the per-layer transposes exist only to match the torch API; a full
#       network should call dense_layer_forward_nhwc directly.
# -----------------------------------------------------------------------------
def dense_layer_forward(x_nchw, params, **kw):
    if isinstance(x_nchw, (list, tuple)):
        x_nchw = jnp.concatenate(x_nchw, axis=1)
    x_nhwc = jnp.transpose(x_nchw, (0, 2, 3, 1))
    out_nhwc = dense_layer_forward_nhwc(x_nhwc, params, **kw)
    return jnp.transpose(out_nhwc, (0, 3, 1, 2))


# -----------------------------------------------------------------------------
# Pure-JAX reference (same math) for correctness checking.
# -----------------------------------------------------------------------------
def dense_layer_reference(x_nchw, params, eps=1e-5):
    x = jnp.transpose(x_nchw, (0, 2, 3, 1))
    s1 = params["gamma1"] / jnp.sqrt(params["var1"] + eps)
    b1 = params["beta1"] - params["mean1"] * s1
    act1 = jnp.maximum(x * s1 + b1, 0.0)
    bott = jnp.einsum("nhwc,cm->nhwm", act1, params["w1"])
    s2 = params["gamma2"] / jnp.sqrt(params["var2"] + eps)
    b2 = params["beta2"] - params["mean2"] * s2
    act2 = jnp.maximum(bott * s2 + b2, 0.0)
    out = lax.conv_general_dilated(
        act2, params["w2"], window_strides=(1, 1), padding="SAME",
        dimension_numbers=("NHWC", "HWIO", "NHWC"))
    return jnp.transpose(out, (0, 3, 1, 2))


if __name__ == "__main__":
    # _DenseLayer(num_input_features=16, growth_rate=8, bn_size=4, drop_rate=0.)
    N, Cin, H, W = 2, 16, 16, 16
    growth_rate, bn_size = 8, 4
    Cmid = bn_size * growth_rate         # 32
    Cout = growth_rate                   # 8

    key = jax.random.PRNGKey(0)
    k = jax.random.split(key, 8)

    x = jax.random.normal(k[0], (N, Cin, H, W), jnp.float32)

    params = {
        # BatchNorm2d(num_input_features) — deterministic synthetic stats
        "gamma1": 1.0 + 0.1 * jax.random.normal(k[1], (Cin,), jnp.float32),
        "beta1": 0.1 * jax.random.normal(k[2], (Cin,), jnp.float32),
        "mean1": 0.05 * jax.random.normal(k[3], (Cin,), jnp.float32),
        "var1": jnp.abs(1.0 + 0.1 * jax.random.normal(k[4], (Cin,), jnp.float32)),
        # Conv2d(Cin, Cmid, 1, bias=False) as (Cin, Cmid)
        "w1": 0.1 * jax.random.normal(k[5], (Cin, Cmid), jnp.float32),
        # BatchNorm2d(Cmid)
        "gamma2": 1.0 + 0.1 * jax.random.normal(k[7], (Cmid,), jnp.float32),
        "beta2": jnp.zeros((Cmid,), jnp.float32),
        "mean2": jnp.zeros((Cmid,), jnp.float32),
        "var2": jnp.ones((Cmid,), jnp.float32),
        # Conv2d(Cmid, Cout, 3, padding=1, bias=False) as HWIO (3,3,Cmid,Cout)
        "w2": 0.1 * jax.random.normal(k[6], (3, 3, Cmid, Cout), jnp.float32),
    }

    ref = jax.block_until_ready(dense_layer_reference(x, params))

    # 1) f32, auto-sized strip (whole image per step -> no halo path)
    out = jax.block_until_ready(dense_layer_forward(x, params))
    assert out.shape == (N, Cout, H, W), out.shape
    assert jnp.allclose(out, ref, rtol=1e-4, atol=1e-4), (
        float(jnp.max(jnp.abs(out - ref))))

    # 2) f32, forced multi-strip (exercises the halo DMA path)
    out_ms = jax.block_until_ready(dense_layer_forward(x, params, row_tile=8))
    assert out_ms.shape == (N, Cout, H, W), out_ms.shape
    assert jnp.allclose(out_ms, ref, rtol=1e-4, atol=1e-4), (
        float(jnp.max(jnp.abs(out_ms - ref))))

    # 3) bf16 compute + bf16 output (f32 accumulation) — loose tolerance
    out_bf16 = jax.block_until_ready(
        dense_layer_forward(x, params, compute_dtype=jnp.bfloat16,
                            out_dtype=jnp.bfloat16))
    assert out_bf16.shape == (N, Cout, H, W), out_bf16.shape
    assert jnp.allclose(out_bf16.astype(jnp.float32), ref, rtol=1e-1, atol=1e-1), (
        float(jnp.max(jnp.abs(out_bf16.astype(jnp.float32) - ref))))

    print("KERNEL_OK")
</pallas_src>

<mosaic_0001>
module attributes {stable_mosaic.version = 11 : i64} {
  func.func @_dense_layer_kernel(%arg0: i32, %arg1: i32, %arg2: memref<16x16x16xf32, #tpu.memory_space<vmem>>, %arg3: memref<1x16xf32, #tpu.memory_space<vmem>>, %arg4: memref<1x16xf32, #tpu.memory_space<vmem>>, %arg5: memref<16x32xf32, #tpu.memory_space<vmem>>, %arg6: memref<1x32xf32, #tpu.memory_space<vmem>>, %arg7: memref<3x3x32x128xf32, #tpu.memory_space<vmem>>, %arg8: memref<1x16x16x128xf32, #tpu.memory_space<vmem>>, %arg9: memref<256x128xf32, #tpu.memory_space<vmem>>, %arg10: memref<18x18x32xf32, #tpu.memory_space<vmem>>) attributes {dimension_semantics = [#tpu.dimension_semantics<parallel>, #tpu.dimension_semantics<parallel>], iteration_bounds = array<i64: 2, 1>, scalar_prefetch = 0 : i64, scratch_operands = 2 : i64, tpu.core_type = #tpu.core_type<tc>, window_params = [{transform_indices = @transform_0, window_bounds = array<i64: 16, 16, 16>}, {pipeline_mode = #tpu.pipeline_mode<synchronous>, transform_indices = @transform_1, window_bounds = array<i64: 1, 16>}, {pipeline_mode = #tpu.pipeline_mode<synchronous>, transform_indices = @transform_2, window_bounds = array<i64: 1, 16>}, {pipeline_mode = #tpu.pipeline_mode<synchronous>, transform_indices = @transform_3, window_bounds = array<i64: 16, 32>}, {pipeline_mode = #tpu.pipeline_mode<synchronous>, transform_indices = @transform_4, window_bounds = array<i64: 1, 32>}, {pipeline_mode = #tpu.pipeline_mode<synchronous>, transform_indices = @transform_5, window_bounds = array<i64: 3, 3, 32, 128>}, {transform_indices = @transform_6, window_bounds = array<i64: 1, 16, 16, 128>}]} {
    %c0 = arith.constant 0 : index
    %c0_0 = arith.constant 0 : index
    %0 = vector.load %arg3[%c0, %c0_0] : memref<1x16xf32, #tpu.memory_space<vmem>>, vector<1x16xf32>
    %c0_1 = arith.constant 0 : index
    %c0_2 = arith.constant 0 : index
    %1 = vector.load %arg4[%c0_1, %c0_2] : memref<1x16xf32, #tpu.memory_space<vmem>>, vector<1x16xf32>
    %c0_3 = arith.constant 0 : index
    %c0_4 = arith.constant 0 : index
    %2 = vector.load %arg6[%c0_3, %c0_4] : memref<1x32xf32, #tpu.memory_space<vmem>>, vector<1x32xf32>
    %c0_5 = arith.constant 0 : index
    %c0_6 = arith.constant 0 : index
    %3 = vector.load %arg5[%c0_5, %c0_6] : memref<16x32xf32, #tpu.memory_space<vmem>>, vector<16x32xf32>
    %c0_7 = arith.constant 0 : index
    %c0_8 = arith.constant 0 : index
    %c0_9 = arith.constant 0 : index
    %4 = vector.load %arg2[%c0_7, %c0_8, %c0_9] : memref<16x16x16xf32, #tpu.memory_space<vmem>>, vector<16x16x16xf32>
    %5 = vector.shape_cast %4 : vector<16x16x16xf32> to vector<256x16xf32>
    %6 = vector.broadcast %0 : vector<1x16xf32> to vector<256x16xf32>
    %7 = arith.mulf %5, %6 : vector<256x16xf32>
    %8 = vector.broadcast %1 : vector<1x16xf32> to vector<256x16xf32>
    %9 = arith.addf %7, %8 : vector<256x16xf32>
    %cst = arith.constant 0.000000e+00 : f32
    %10 = vector.broadcast %cst : f32 to vector<256x16xf32>
    %11 = arith.maximumf %9, %10 : vector<256x16xf32>
    %cst_10 = arith.constant dense<0.000000e+00> : vector<256x32xf32>
    %12 = tpu.matmul %11, %3, %cst_10 {dimension_numbers = #tpu.dot_dimension_numbers<[1], [0], [0], [1], [0, 0, 1, 1], [], []>} : vector<256x16xf32>, vector<16x32xf32>, vector<256x32xf32> -> vector<256x32xf32>
    %13 = vector.broadcast %2 : vector<1x32xf32> to vector<256x32xf32>
    %14 = arith.addf %12, %13 : vector<256x32xf32>
    %cst_11 = arith.constant 0.000000e+00 : f32
    %15 = vector.broadcast %cst_11 : f32 to vector<256x32xf32>
    %16 = arith.maximumf %14, %15 : vector<256x32xf32>
    %17 = vector.shape_cast %16 : vector<256x32xf32> to vector<16x16x32xf32>
    %c1 = arith.constant 1 : index
    %c1_12 = arith.constant 1 : index
    %c0_13 = arith.constant 0 : index
    %18 = vector.load %arg10[%c1, %c1_12, %c0_13] : memref<18x18x32xf32, #tpu.memory_space<vmem>>, vector<16x16x32xf32>
    tpu.vector_store %arg10[%c1, %c1_12, %c0_13], %17 {strides = array<i32>} : memref<18x18x32xf32, #tpu.memory_space<vmem>>, vector<16x16x32xf32>,
    %cst_14 = arith.constant 0.000000e+00 : f32
    %19 = vector.broadcast %cst_14 : f32 to vector<18x1x32xf32>
    %c0_15 = arith.constant 0 : index
    %c0_16 = arith.constant 0 : index
    %c0_17 = arith.constant 0 : index
    %20 = vector.load %arg10[%c0_15, %c0_16, %c0_17] : memref<18x18x32xf32, #tpu.memory_space<vmem>>, vector<18x1x32xf32>
    tpu.vector_store %arg10[%c0_15, %c0_16, %c0_17], %19 {strides = array<i32>} : memref<18x18x32xf32, #tpu.memory_space<vmem>>, vector<18x1x32xf32>,
    %c0_18 = arith.constant 0 : index
    %c17 = arith.constant 17 : index
    %c0_19 = arith.constant 0 : index
    %21 = vector.load %arg10[%c0_18, %c17, %c0_19] : memref<18x18x32xf32, #tpu.memory_space<vmem>>, vector<18x1x32xf32>
    tpu.vector_store %arg10[%c0_18, %c17, %c0_19], %19 {strides = array<i32>} : memref<18x18x32xf32, #tpu.memory_space<vmem>>, vector<18x1x32xf32>,
    %cst_20 = arith.constant 0.000000e+00 : f32
    %22 = vector.broadcast %cst_20 : f32 to vector<1x16x32xf32>
    %c0_21 = arith.constant 0 : index
    %c1_22 = arith.constant 1 : index
    %c0_23 = arith.constant 0 : index
    %23 = vector.load %arg10[%c0_21, %c1_22, %c0_23] : memref<18x18x32xf32, #tpu.memory_space<vmem>>, vector<1x16x32xf32>
    tpu.vector_store %arg10[%c0_21, %c1_22, %c0_23], %22 {strides = array<i32>} : memref<18x18x32xf32, #tpu.memory_space<vmem>>, vector<1x16x32xf32>,
    %c17_24 = arith.constant 17 : index
    %c1_25 = arith.constant 1 : index
    %c0_26 = arith.constant 0 : index
    %24 = vector.load %arg10[%c17_24, %c1_25, %c0_26] : memref<18x18x32xf32, #tpu.memory_space<vmem>>, vector<1x16x32xf32>
    tpu.vector_store %arg10[%c17_24, %c1_25, %c0_26], %22 {strides = array<i32>} : memref<18x18x32xf32, #tpu.memory_space<vmem>>, vector<1x16x32xf32>,
    %c0_27 = arith.constant 0 : index
    %c0_28 = arith.constant 0 : index
    %c0_29 = arith.constant 0 : index
    %25 = vector.load %arg10[%c0_27, %c0_28, %c0_29] : memref<18x18x32xf32, #tpu.memory_space<vmem>>, vector<16x16x32xf32>
    %26 = vector.shape_cast %25 : vector<16x16x32xf32> to vector<256x32xf32>
    %c0_30 = arith.constant 0 : index
    %c0_31 = arith.constant 0 : index
    %c0_32 = arith.constant 0 : index
    %c0_33 = arith.constant 0 : index
    %27 = vector.load %arg7[%c0_30, %c0_31, %c0_32, %c0_33] : memref<3x3x32x128xf32, #tpu.memory_space<vmem>>, vector<1x1x32x128xf32>
    %28 = vector.shape_cast %27 : vector<1x1x32x128xf32> to vector<32x128xf32>
    %cst_34 = arith.constant dense<0.000000e+00> : vector<256x128xf32>
    %29 = tpu.matmul %26, %28, %cst_34 {dimension_numbers = #tpu.dot_dimension_numbers<[1], [0], [0], [1], [0, 0, 1, 1], [], []>} : vector<256x32xf32>, vector<32x128xf32>, vector<256x128xf32> -> vector<256x128xf32>
    %c0_35 = arith.constant 0 : index
    %c0_36 = arith.constant 0 : index
    %30 = vector.load %arg9[%c0_35, %c0_36] : memref<256x128xf32, #tpu.memory_space<vmem>>, vector<256x128xf32>
    tpu.vector_store %arg9[%c0_35, %c0_36], %29 {strides = array<i32>} : memref<256x128xf32, #tpu.memory_space<vmem>>, vector<256x128xf32>,
    %c0_37 = arith.constant 0 : index
    %c1_38 = arith.constant 1 : index
    %c0_39 = arith.constant 0 : index
    %31 = vector.load %arg10[%c0_37, %c1_38, %c0_39] : memref<18x18x32xf32, #tpu.memory_space<vmem>>, vector<16x16x32xf32>
    %32 = vector.shape_cast %31 : vector<16x16x32xf32> to vector<256x32xf32>
    %c0_40 = arith.constant 0 : index
    %c1_41 = arith.constant 1 : index
    %c0_42 = arith.constant 0 : index
    %c0_43 = arith.constant 0 : index
    %33 = vector.load %arg7[%c0_40, %c1_41, %c0_42, %c0_43] : memref<3x3x32x128xf32, #tpu.memory_space<vmem>>, vector<1x1x32x128xf32>
    %34 = vector.shape_cast %33 : vector<1x1x32x128xf32> to vector<32x128xf32>
    %cst_44 = arith.constant dense<0.000000e+00> : vector<256x128xf32>
    %35 = tpu.matmul %32, %34, %cst_44 {dimension_numbers = #tpu.dot_dimension_numbers<[1], [0], [0], [1], [0, 0, 1, 1], [], []>} : vector<256x32xf32>, vector<32x128xf32>, vector<256x128xf32> -> vector<256x128xf32>
    %c0_45 = arith.constant 0 : index
    %c0_46 = arith.constant 0 : index
    %36 = vector.load %arg9[%c0_45, %c0_46] : memref<256x128xf32, #tpu.memory_space<vmem>>, vector<256x128xf32>
    %37 = arith.addf %36, %35 : vector<256x128xf32>
    %c0_47 = arith.constant 0 : index
    %c0_48 = arith.constant 0 : index
    %38 = vector.load %arg9[%c0_47, %c0_48] : memref<256x128xf32, #tpu.memory_space<vmem>>, vector<256x128xf32>
    tpu.vector_store %arg9[%c0_47, %c0_48], %37 {strides = array<i32>} : memref<256x128xf32, #tpu.memory_space<vmem>>, vector<256x128xf32>,
    %c0_49 = arith.constant 0 : index
    %c2 = arith.constant 2 : index
    %c0_50 = arith.constant 0 : index
    %39 = vector.load %arg10[%c0_49, %c2, %c0_50] : memref<18x18x32xf32, #tpu.memory_space<vmem>>, vector<16x16x32xf32>
    %40 = vector.shape_cast %39 : vector<16x16x32xf32> to vector<256x32xf32>
    %c0_51 = arith.constant 0 : index
    %c2_52 = arith.constant 2 : index
    %c0_53 = arith.constant 0 : index
    %c0_54 = arith.constant 0 : index
    %41 = vector.load %arg7[%c0_51, %c2_52, %c0_53, %c0_54] : memref<3x3x32x128xf32, #tpu.memory_space<vmem>>, vector<1x1x32x128xf32>
    %42 = vector.shape_cast %41 : vector<1x1x32x128xf32> to vector<32x128xf32>
    %cst_55 = arith.constant dense<0.000000e+00> : vector<256x128xf32>
    %43 = tpu.matmul %40, %42, %cst_55 {dimension_numbers = #tpu.dot_dimension_numbers<[1], [0], [0], [1], [0, 0, 1, 1], [], []>} : vector<256x32xf32>, vector<32x128xf32>, vector<256x128xf32> -> vector<256x128xf32>
    %c0_56 = arith.constant 0 : index
    %c0_57 = arith.constant 0 : index
    %44 = vector.load %arg9[%c0_56, %c0_57] : memref<256x128xf32, #tpu.memory_space<vmem>>, vector<256x128xf32>
    %45 = arith.addf %44, %43 : vector<256x128xf32>
    %c0_58 = arith.constant 0 : index
    %c0_59 = arith.constant 0 : index
    %46 = vector.load %arg9[%c0_58, %c0_59] : memref<256x128xf32, #tpu.memory_space<vmem>>, vector<256x128xf32>
    tpu.vector_store %arg9[%c0_58, %c0_59], %45 {strides = array<i32>} : memref<256x128xf32, #tpu.memory_space<vmem>>, vector<256x128xf32>,
    %c1_60 = arith.constant 1 : index
    %c0_61 = arith.constant 0 : index
    %c0_62 = arith.constant 0 : index
    %47 = vector.load %arg10[%c1_60, %c0_61, %c0_62] : memref<18x18x32xf32, #tpu.memory_space<vmem>>, vector<16x16x32xf32>
    %48 = vector.shape_cast %47 : vector<16x16x32xf32> to vector<256x32xf32>
    %c1_63 = arith.constant 1 : index
    %c0_64 = arith.constant 0 : index
    %c0_65 = arith.constant 0 : index
    %c0_66 = arith.constant 0 : index
    %49 = vector.load %arg7[%c1_63, %c0_64, %c0_65, %c0_66] : memref<3x3x32x128xf32, #tpu.memory_space<vmem>>, vector<1x1x32x128xf32>
    %50 = vector.shape_cast %49 : vector<1x1x32x128xf32> to vector<32x128xf32>
    %cst_67 = arith.constant dense<0.000000e+00> : vector<256x128xf32>
    %51 = tpu.matmul %48, %50, %cst_67 {dimension_numbers = #tpu.dot_dimension_numbers<[1], [0], [0], [1], [0, 0, 1, 1], [], []>} : vector<256x32xf32>, vector<32x128xf32>, vector<256x128xf32> -> vector<256x128xf32>
    %c0_68 = arith.constant 0 : index
    %c0_69 = arith.constant 0 : index
    %52 = vector.load %arg9[%c0_68, %c0_69] : memref<256x128xf32, #tpu.memory_space<vmem>>, vector<256x128xf32>
    %53 = arith.addf %52, %51 : vector<256x128xf32>
    %c0_70 = arith.constant 0 : index
    %c0_71 = arith.constant 0 : index
    %54 = vector.load %arg9[%c0_70, %c0_71] : memref<256x128xf32, #tpu.memory_space<vmem>>, vector<256x128xf32>
    tpu.vector_store %arg9[%c0_70, %c0_71], %53 {strides = array<i32>} : memref<256x128xf32, #tpu.memory_space<vmem>>, vector<256x128xf32>,
    %c1_72 = arith.constant 1 : index
    %c1_73 = arith.constant 1 : index
    %c0_74 = arith.constant 0 : index
    %55 = vector.load %arg10[%c1_72, %c1_73, %c0_74] : memref<18x18x32xf32, #tpu.memory_space<vmem>>, vector<16x16x32xf32>
    %56 = vector.shape_cast %55 : vector<16x16x32xf32> to vector<256x32xf32>
    %c1_75 = arith.constant 1 : index
    %c1_76 = arith.constant 1 : index
    %c0_77 = arith.constant 0 : index
    %c0_78 = arith.constant 0 : index
    %57 = vector.load %arg7[%c1_75, %c1_76, %c0_77, %c0_78] : memref<3x3x32x128xf32, #tpu.memory_space<vmem>>, vector<1x1x32x128xf32>
    %58 = vector.shape_cast %57 : vector<1x1x32x128xf32> to vector<32x128xf32>
    %cst_79 = arith.constant dense<0.000000e+00> : vector<256x128xf32>
    %59 = tpu.matmul %56, %58, %cst_79 {dimension_numbers = #tpu.dot_dimension_numbers<[1], [0], [0], [1], [0, 0, 1, 1], [], []>} : vector<256x32xf32>, vector<32x128xf32>, vector<256x128xf32> -> vector<256x128xf32>
    %c0_80 = arith.constant 0 : index
    %c0_81 = arith.constant 0 : index
    %60 = vector.load %arg9[%c0_80, %c0_81] : memref<256x128xf32, #tpu.memory_space<vmem>>, vector<256x128xf32>
    %61 = arith.addf %60, %59 : vector<256x128xf32>
    %c0_82 = arith.constant 0 : index
    %c0_83 = arith.constant 0 : index
    %62 = vector.load %arg9[%c0_82, %c0_83] : memref<256x128xf32, #tpu.memory_space<vmem>>, vector<256x128xf32>
    tpu.vector_store %arg9[%c0_82, %c0_83], %61 {strides = array<i32>} : memref<256x128xf32, #tpu.memory_space<vmem>>, vector<256x128xf32>,
    %c1_84 = arith.constant 1 : index
    %c2_85 = arith.constant 2 : index
    %c0_86 = arith.constant 0 : index
    %63 = vector.load %arg10[%c1_84, %c2_85, %c0_86] : memref<18x18x32xf32, #tpu.memory_space<vmem>>, vector<16x16x32xf32>
    %64 = vector.shape_cast %63 : vector<16x16x32xf32> to vector<256x32xf32>
    %c1_87 = arith.constant 1 : index
    %c2_88 = arith.constant 2 : index
    %c0_89 = arith.constant 0 : index
    %c0_90 = arith.constant 0 : index
    %65 = vector.load %arg7[%c1_87, %c2_88, %c0_89, %c0_90] : memref<3x3x32x128xf32, #tpu.memory_space<vmem>>, vector<1x1x32x128xf32>
    %66 = vector.shape_cast %65 : vector<1x1x32x128xf32> to vector<32x128xf32>
    %cst_91 = arith.constant dense<0.000000e+00> : vector<256x128xf32>
    %67 = tpu.matmul %64, %66, %cst_91 {dimension_numbers = #tpu.dot_dimension_numbers<[1], [0], [0], [1], [0, 0, 1, 1], [], []>} : vector<256x32xf32>, vector<32x128xf32>, vector<256x128xf32> -> vector<256x128xf32>
    %c0_92 = arith.constant 0 : index
    %c0_93 = arith.constant 0 : index
    %68 = vector.load %arg9[%c0_92, %c0_93] : memref<256x128xf32, #tpu.memory_space<vmem>>, vector<256x128xf32>
    %69 = arith.addf %68, %67 : vector<256x128xf32>
    %c0_94 = arith.constant 0 : index
    %c0_95 = arith.constant 0 : index
    %70 = vector.load %arg9[%c0_94, %c0_95] : memref<256x128xf32, #tpu.memory_space<vmem>>, vector<256x128xf32>
    tpu.vector_store %arg9[%c0_94, %c0_95], %69 {strides = array<i32>} : memref<256x128xf32, #tpu.memory_space<vmem>>, vector<256x128xf32>,
    %c2_96 = arith.constant 2 : index
    %c0_97 = arith.constant 0 : index
    %c0_98 = arith.constant 0 : index
    %71 = vector.load %arg10[%c2_96, %c0_97, %c0_98] : memref<18x18x32xf32, #tpu.memory_space<vmem>>, vector<16x16x32xf32>
    %72 = vector.shape_cast %71 : vector<16x16x32xf32> to vector<256x32xf32>
    %c2_99 = arith.constant 2 : index
    %c0_100 = arith.constant 0 : index
    %c0_101 = arith.constant 0 : index
    %c0_102 = arith.constant 0 : index
    %73 = vector.load %arg7[%c2_99, %c0_100, %c0_101, %c0_102] : memref<3x3x32x128xf32, #tpu.memory_space<vmem>>, vector<1x1x32x128xf32>
    %74 = vector.shape_cast %73 : vector<1x1x32x128xf32> to vector<32x128xf32>
    %cst_103 = arith.constant dense<0.000000e+00> : vector<256x128xf32>
    %75 = tpu.matmul %72, %74, %cst_103 {dimension_numbers = #tpu.dot_dimension_numbers<[1], [0], [0], [1], [0, 0, 1, 1], [], []>} : vector<256x32xf32>, vector<32x128xf32>, vector<256x128xf32> -> vector<256x128xf32>
    %c0_104 = arith.constant 0 : index
    %c0_105 = arith.constant 0 : index
    %76 = vector.load %arg9[%c0_104, %c0_105] : memref<256x128xf32, #tpu.memory_space<vmem>>, vector<256x128xf32>
    %77 = arith.addf %76, %75 : vector<256x128xf32>
    %c0_106 = arith.constant 0 : index
    %c0_107 = arith.constant 0 : index
    %78 = vector.load %arg9[%c0_106, %c0_107] : memref<256x128xf32, #tpu.memory_space<vmem>>, vector<256x128xf32>
    tpu.vector_store %arg9[%c0_106, %c0_107], %77 {strides = array<i32>} : memref<256x128xf32, #tpu.memory_space<vmem>>, vector<256x128xf32>,
    %c2_108 = arith.constant 2 : index
    %c1_109 = arith.constant 1 : index
    %c0_110 = arith.constant 0 : index
    %79 = vector.load %arg10[%c2_108, %c1_109, %c0_110] : memref<18x18x32xf32, #tpu.memory_space<vmem>>, vector<16x16x32xf32>
    %80 = vector.shape_cast %79 : vector<16x16x32xf32> to vector<256x32xf32>
    %c2_111 = arith.constant 2 : index
    %c1_112 = arith.constant 1 : index
    %c0_113 = arith.constant 0 : index
    %c0_114 = arith.constant 0 : index
    %81 = vector.load %arg7[%c2_111, %c1_112, %c0_113, %c0_114] : memref<3x3x32x128xf32, #tpu.memory_space<vmem>>, vector<1x1x32x128xf32>
    %82 = vector.shape_cast %81 : vector<1x1x32x128xf32> to vector<32x128xf32>
    %cst_115 = arith.constant dense<0.000000e+00> : vector<256x128xf32>
    %83 = tpu.matmul %80, %82, %cst_115 {dimension_numbers = #tpu.dot_dimension_numbers<[1], [0], [0], [1], [0, 0, 1, 1], [], []>} : vector<256x32xf32>, vector<32x128xf32>, vector<256x128xf32> -> vector<256x128xf32>
    %c0_116 = arith.constant 0 : index
    %c0_117 = arith.constant 0 : index
    %84 = vector.load %arg9[%c0_116, %c0_117] : memref<256x128xf32, #tpu.memory_space<vmem>>, vector<256x128xf32>
    %85 = arith.addf %84, %83 : vector<256x128xf32>
    %c0_118 = arith.constant 0 : index
    %c0_119 = arith.constant 0 : index
    %86 = vector.load %arg9[%c0_118, %c0_119] : memref<256x128xf32, #tpu.memory_space<vmem>>, vector<256x128xf32>
    tpu.vector_store %arg9[%c0_118, %c0_119], %85 {strides = array<i32>} : memref<256x128xf32, #tpu.memory_space<vmem>>, vector<256x128xf32>,
    %c2_120 = arith.constant 2 : index
    %c2_121 = arith.constant 2 : index
    %c0_122 = arith.constant 0 : index
    %87 = vector.load %arg10[%c2_120, %c2_121, %c0_122] : memref<18x18x32xf32, #tpu.memory_space<vmem>>, vector<16x16x32xf32>
    %88 = vector.shape_cast %87 : vector<16x16x32xf32> to vector<256x32xf32>
    %c2_123 = arith.constant 2 : index
    %c2_124 = arith.constant 2 : index
    %c0_125 = arith.constant 0 : index
    %c0_126 = arith.constant 0 : index
    %89 = vector.load %arg7[%c2_123, %c2_124, %c0_125, %c0_126] : memref<3x3x32x128xf32, #tpu.memory_space<vmem>>, vector<1x1x32x128xf32>
    %90 = vector.shape_cast %89 : vector<1x1x32x128xf32> to vector<32x128xf32>
    %cst_127 = arith.constant dense<0.000000e+00> : vector<256x128xf32>
    %91 = tpu.matmul %88, %90, %cst_127 {dimension_numbers = #tpu.dot_dimension_numbers<[1], [0], [0], [1], [0, 0, 1, 1], [], []>} : vector<256x32xf32>, vector<32x128xf32>, vector<256x128xf32> -> vector<256x128xf32>
    %c0_128 = arith.constant 0 : index
    %c0_129 = arith.constant 0 : index
    %92 = vector.load %arg9[%c0_128, %c0_129] : memref<256x128xf32, #tpu.memory_space<vmem>>, vector<256x128xf32>
    %93 = arith.addf %92, %91 : vector<256x128xf32>
    %c0_130 = arith.constant 0 : index
    %c0_131 = arith.constant 0 : index
    %94 = vector.load %arg9[%c0_130, %c0_131] : memref<256x128xf32, #tpu.memory_space<vmem>>, vector<256x128xf32>
    tpu.vector_store %arg9[%c0_130, %c0_131], %93 {strides = array<i32>} : memref<256x128xf32, #tpu.memory_space<vmem>>, vector<256x128xf32>,
    %c0_132 = arith.constant 0 : index
    %c0_133 = arith.constant 0 : index
    %95 = vector.load %arg9[%c0_132, %c0_133] : memref<256x128xf32, #tpu.memory_space<vmem>>, vector<256x128xf32>
    %96 = vector.shape_cast %95 : vector<256x128xf32> to vector<1x16x16x128xf32>
    %c0_134 = arith.constant 0 : index
    %c0_135 = arith.constant 0 : index
    %c0_136 = arith.constant 0 : index
    %c0_137 = arith.constant 0 : index
    %97 = vector.load %arg8[%c0_134, %c0_135, %c0_136, %c0_137] : memref<1x16x16x128xf32, #tpu.memory_space<vmem>>, vector<1x16x16x128xf32>
    tpu.vector_store %arg8[%c0_134, %c0_135, %c0_136, %c0_137], %96 {strides = array<i32>} : memref<1x16x16x128xf32, #tpu.memory_space<vmem>>, vector<1x16x16x128xf32>,
    return
  }
  func.func @transform_0(%arg0: i32, %arg1: i32) -> (i32, i32, i32) {
    %c1_i32 = arith.constant 1 : i32
    %0 = arith.muli %arg0, %c1_i32 : i32
    %1 = arith.addi %0, %arg1 : i32
    %c0_i32 = arith.constant 0 : i32
    %c0_i32_0 = arith.constant 0 : i32
    %c0_i32_1 = arith.constant 0 : i32
    return %1, %c0_i32, %c0_i32_0 : i32, i32, i32
  }
  func.func @transform_1(%arg0: i32, %arg1: i32) -> (i32, i32) {
    %c0_i32 = arith.constant 0 : i32
    %c0_i32_0 = arith.constant 0 : i32
    %c0_i32_1 = arith.constant 0 : i32
    return %c0_i32, %c0_i32_0 : i32, i32
  }
  func.func @transform_2(%arg0: i32, %arg1: i32) -> (i32, i32) {
    %c0_i32 = arith.constant 0 : i32
    %c0_i32_0 = arith.constant 0 : i32
    %c0_i32_1 = arith.constant 0 : i32
    return %c0_i32, %c0_i32_0 : i32, i32
  }
  func.func @transform_3(%arg0: i32, %arg1: i32) -> (i32, i32) {
    %c0_i32 = arith.constant 0 : i32
    %c0_i32_0 = arith.constant 0 : i32
    %c0_i32_1 = arith.constant 0 : i32
    return %c0_i32, %c0_i32_0 : i32, i32
  }
  func.func @transform_4(%arg0: i32, %arg1: i32) -> (i32, i32) {
    %c0_i32 = arith.constant 0 : i32
    %c0_i32_0 = arith.constant 0 : i32
    %c0_i32_1 = arith.constant 0 : i32
    return %c0_i32, %c0_i32_0 : i32, i32
  }
  func.func @transform_5(%arg0: i32, %arg1: i32) -> (i32, i32, i32, i32) {
    %c0_i32 = arith.constant 0 : i32
    %c0_i32_0 = arith.constant 0 : i32
    %c0_i32_1 = arith.constant 0 : i32
    %c0_i32_2 = arith.constant 0 : i32
    %c0_i32_3 = arith.constant 0 : i32
    return %c0_i32, %c0_i32_0, %c0_i32_1, %c0_i32_2 : i32, i32, i32, i32
  }
  func.func @transform_6(%arg0: i32, %arg1: i32) -> (i32, i32, i32, i32) {
    %c0_i32 = arith.constant 0 : i32
    %c0_i32_0 = arith.constant 0 : i32
    %c0_i32_1 = arith.constant 0 : i32
    return %arg0, %arg1, %c0_i32, %c0_i32_0 : i32, i32, i32, i32
  }
}

</mosaic_0001>

<bundles_post_ra>
// kernel: tpu_custom_call.1
= control target key start
LH: loop header
LB: loop body
LE: loop exit
PB: predicated region body
PF: predicated region fallthrough
CT: control target
= control target key end

     0   :  { %11 = vsyncpa [#allocation5], 0  ;;  %s8158_s0 = inlined_call_operand.vmem [shape: f32[32,16,16], index: 0, kind: input, shape index: {}]   ;;  %s8159_s1 = inlined_call_operand.vmem [shape: f32[1,16], index: 1, kind: input, shape index: {}]   ;;  %s8160_s2 = inlined_call_operand.vmem [shape: f32[1,16], index: 2, kind: input, shape index: {}]   ;;  %s8161_s3 = inlined_call_operand.vmem [shape: f32[16,32], index: 3, kind: input, shape index: {}]   ;;  %s8162_s4 = inlined_call_operand.vmem [shape: f32[1,32], index: 4, kind: input, shape index: {}]   ;;  %s8163_s5 = inlined_call_operand.vmem [shape: f32[3,3,32,128], index: 5, kind: input, shape index: {}]   ;;  %s8164_s6 = inlined_call_operand.hbm [shape: f32[2,16,16,128], index: 6, kind: output, shape index: {}]  }
   0x1   :  { %13 = vsyncpa [#allocation5 + $0x1], 0  ;;  %s6828_s21 = smov 0   ;;  %s6830_s22 = smov 0  }
   0x2   :  { %s6832_s23 = smov 0   ;;  %s6834_s24 = smov 0  }
   0x3   :  { %s6836_s25 = smov 0   ;;  %s6838_s26 = smov 0  }
   0x4 LB: > { %s5034_s27 = sadd.s32 4294967295, %s6787_s26   ;;  %s5035_s28 = sadd.s32 4294967294, %s6787_s26   ;;  %s6787_s26 = sphi %s6838_s26, %s19_s26   ;;  %s6783_s25 = sphi %s6836_s25, %s8282_s25   ;;  %s6779_s24 = sphi %s6834_s24, %s8281_s24   ;;  %s6775_s23 = sphi %s6832_s23, %s8280_s23   ;;  %s6771_s22 = sphi %s6830_s22, %s8279_s22   ;;  %s6767_s21 = sphi %s6828_s21, %s8278_s21  }
   0x5   : > { %s31_s29 = sadd.s32 1, %s6783_s25  ;;  %s173_s30 = sadd.s32 1, %s6775_s23 }
   0x6   : > { %p33_p0 = scmp.ge.s32.totalorder %s31_s29, 2  ;;  %p183_p1 = scmp.ne.s32.totalorder %s6775_s23, %s6771_s22 }
   0x7   : > { %p184_p2 = scmp.eq.s32.totalorder %s5034_s27, 1  ;;  %p189_p3 = scmp.ne.s32.totalorder %s6771_s22, %s6767_s21 }
   0x8   : > { %s8284_s29 = smov (%p33_p0, %s31_s29), 0  ;;  %p190_p5 = scmp.eq.s32.totalorder %s5035_s28, 1 }
   0x9   : > { %p6868_p4 = por %p184_p2, %p183_p1  ;;  %s168_s8 = ssub.s32 %s6783_s25, %s8284_s29 }
   0xa   : > { %p5038_p6 = scmp.ge.s32.totalorder %s6787_s26, 1  ;;  %p171_p7 = scmp.eq.s32.totalorder %s168_s8, 0 }
   0xb   : > { %p6875_p8 = por %p190_p5, %p189_p3  ;;  %p235_p9 = scmp.lt.s32.totalorder %s6787_s26, 3 }
   0xc   : > { %s6881_s10 = scalar_select %p171_p7, %s6775_s23, %s173_s30  }
   0xd   : > { %p236_p10 = pnand %p5038_p6, %p235_p9 }
   0xf   : > { %239 = sbr.rel (%p236_p10) target bundleno = 810 (0x32a), region = 44 }
  0x16   : > { %v280_v0 = vld [vmem:[%s8161_s3] sm:$0xff]  ;;  %v281_v1 = vld [vmem:[%s8161_s3 + $0x8] sm:$0xff]  ;;  %s5040_s15 = sshll.u32 %s6779_s24, 4  ;;  %vm428_vm0 = vcmask 130048   ;;  %vm783_vm1 = vcmask 261120   ;;  %vm816_vm2 = vcmask 253952  }
  0x17   : > { %v6319_v2 = vpack.c.bf16 %v281_v1, %v280_v0  ;;  %p269_p11 = scmp.lt.s32.totalorder %s5040_s15, 31  ;;  %v6893_v3 = vld [vmem:[%s8159_s1] ss:$0 sm:$0xff]  ;;  %s264_s14 = sand.u32 1, %s6771_s22  }
  0x18   : > { %v6903_v4 = vld [vmem:[%s8160_s2] ss:$0 sm:$0xff]  ;;  %s5404_s17 = sshll.u32 %s6779_s24, 12  ;;  %s8112_s24 = scalar_lea.sflag [#allocation5], %s264_s14 }
  0x19   : > { %6320 = vmatprep.subr.bf16.mxu0 %v6319_v2  ;;  %s8286_s15 = smov (!%p269_p11, %s5040_s15), 31  ;;  %s6790_s30 = smov [#allocation4]  }
  0x1a   : > { %6322 = vmatpush3.bf16.msra.mxu0 %v6319_v2  ;;  %s5403_s16 = sshll.u32 %s8286_s15, 4  ;;  %s5039_s15 = sshll.u32 %s264_s14, 8 }
  0x1b   : > { %s6898_s27 = scalar_lea.vmem %s8158_s0, %s5403_s16  ;;  %s8049_s16 = scalar_lea.vmem [#allocation4], %s5039_s15 }
  0x1c   : > { %v282_v5 = vld [vmem:[%s6898_s27] sm:$0xff]  ;;  %v283_v6 = vld [vmem:[%s6898_s27 + $0x8] sm:$0xff]  ;;  %v284_v7 = vld [vmem:[%s6898_s27 + $0x10] sm:$0xff]  ;;  %s4961_s18 = sshll.u32 %s8049_s16, 4  ;;  %s6713_s8 = sshll.u32 %s6790_s30, 4  ;;  %s8105_s18 = int_to_ptr.vmem [resolvable:$true] %s4961_s18  ;;  %s6714_s8 = int_to_ptr.vmem [resolvable:$false] %s6713_s8 }
  0x1d   : > { %v320_v8 = vmul.f32 %v6893_v3, %v282_v5  ;;  %v321_v9 = vmul.f32 %v6893_v3, %v283_v6  ;;  %v322_v10 = vmul.f32 %v6893_v3, %v284_v7  ;;  %v285_v11 = vld [vmem:[%s6898_s27 + $0x18] sm:$0xff]  ;;  %v286_v12 = vld [vmem:[%s6898_s27 + $0x20] sm:$0xff]  ;;  %v287_v13 = vld [vmem:[%s6898_s27 + $0x28] sm:$0xff]  ;;  %s6709_s28 = scalar_lea.vmem %s8105_s18, 4096  ;;  %s6715_s11 = scalar_lea.vmem %s6714_s8, 8192 }
  0x1e   : > { %v323_v14 = vmul.f32 %v6893_v3, %v285_v11  ;;  %v324_v15 = vmul.f32 %v6893_v3, %v286_v12  ;;  %v288_v16 = vld [vmem:[%s6898_s27 + $0x30] sm:$0xff]  ;;  %v325_v21 = vmul.f32 %v6893_v3, %v287_v13  ;;  %v289_v27 = vld [vmem:[%s6898_s27 + $0x38] sm:$0xff]  ;;  %v290_v28 = vld [vmem:[%s6898_s27 + $0x40] sm:$0xff]  ;;  %p6710_p12 = scmp.ne.s32.totalorder %s8105_s18, %s6709_s28  ;;  %p6716_p1 = scmp.lt.s32.totalorder %s8105_s18, %s6714_s8 }
  0x1f   : > { %v358_v17 = vadd.f32 %v6903_v4, %v320_v8  ;;  %v359_v18 = vadd.f32 %v6903_v4, %v321_v9  ;;  %v360_v19 = vadd.f32 %v6903_v4, %v322_v10  ;;  %v326_v22 = vmul.f32 %v6893_v3, %v288_v16  ;;  %v291_v35 = vld [vmem:[%s6898_s27 + $0x48] sm:$0xff]  ;;  %v292_v36 = vld [vmem:[%s6898_s27 + $0x50] sm:$0xff]  ;;  %v293_v43 = vld [vmem:[%s6898_s27 + $0x58] sm:$0xff]  ;;  %p6717_p2 = scmp.lt.s32.totalorder %s6715_s11, %s6709_s28 }
  0x20   : > { %v361_v20 = vadd.f32 %v6903_v4, %v323_v14  ;;  %v362_v26 = vadd.f32 %v6903_v4, %v324_v15  ;;  %v363_v30 = vadd.f32 %v6903_v4, %v325_v21  ;;  %v327_v31 = vmul.f32 %v6893_v3, %v289_v27  ;;  %v294_v44 = vld [vmem:[%s6898_s27 + $0x60] sm:$0xff]  ;;  %v295_v51 = vld [vmem:[%s6898_s27 + $0x68] sm:$0xff]  ;;  %v296_v52 = vld [vmem:[%s6898_s27 + $0x70] sm:$0xff]  ;;  %p6711_p13 = pnand %p6710_p12, %p6868_p4 }
  0x21   : > { %v390_v23 = vmax.f32 %v358_v17, 0.0  ;;  %v391_v24 = vmax.f32 %v359_v18, 0.0  ;;  %v392_v25 = vmax.f32 %v360_v19, 0.0  ;;  %v364_v33 = vadd.f32 %v6903_v4, %v326_v22  ;;  %v297_v59 = vld [vmem:[%s6898_s27 + $0x78] sm:$0xff]  ;;  %v298_v60 = vld [vmem:[%s6898_s27 + $0x80] sm:$0xff]  ;;  %v299_v5 = vld [vmem:[%s6898_s27 + $0x88] sm:$0xff]  ;;  %p6718_p3 = por %p6717_p2, %p6716_p1 }
  0x22   : > { %v393_v29 = vmax.f32 %v361_v20, 0.0  ;;  %v394_v32 = vmax.f32 %v362_v26, 0.0  ;;  %v328_v34 = vmul.f32 %v6893_v3, %v290_v28  ;;  %v395_v37 = vmax.f32 %v363_v30, 0.0  ;;  %v300_v6 = vld [vmem:[%s6898_s27 + $0x90] sm:$0xff]  ;;  %v301_v13 = vld [vmem:[%s6898_s27 + $0x98] sm:$0xff]  ;;  %v302_v14 = vld [vmem:[%s6898_s27 + $0xa0] sm:$0xff]  ;;  %p6712_p0 = pneg %p6711_p13 }
  0x23   : > { %5767 = vmatprep.mubr.msk.f32.mxu0 %vm428_vm0, %v390_v23  ;;  %v365_v38 = vadd.f32 %v6903_v4, %v327_v31  ;;  %v329_v39 = vmul.f32 %v6893_v3, %v291_v35  ;;  %v396_v40 = vmax.f32 %v364_v33, 0.0  ;;  %v330_v42 = vmul.f32 %v6893_v3, %v292_v36  ;;  %v303_v21 = vld [vmem:[%s6898_s27 + $0xa8] sm:$0xff]  ;;  %v304_v22 = vld [vmem:[%s6898_s27 + $0xb0] sm:$0xff]  ;;  %v306_v30 = vld [vmem:[%s6898_s27 + $0xc0] sm:$0xff] }
  0x24   : > { %5768 = vmatmul.mubr.msk.f32.vlgmr.msra.gmra.mrb[0].mxu0 %vm428_vm0, %v391_v24  ;;  %v366_v41 = vadd.f32 %v6903_v4, %v328_v34  ;;  %v331_v47 = vmul.f32 %v6893_v3, %v293_v43  ;;  %v332_v50 = vmul.f32 %v6893_v3, %v294_v44  ;;  %v333_v55 = vmul.f32 %v6893_v3, %v295_v51  ;;  %p6719_p5 = pnand %p6718_p3, %p6712_p0 }
  0x25   : > { %5770 = vmatprep.mubr.msk.f32.mxu0 %vm428_vm0, %v392_v25  ;;  %v397_v45 = vmax.f32 %v365_v38, 0.0  ;;  %v367_v46 = vadd.f32 %v6903_v4, %v329_v39  ;;  %v368_v49 = vadd.f32 %v6903_v4, %v330_v42  ;;  %v334_v58 = vmul.f32 %v6893_v3, %v296_v52  ;;  %v308_v38 = vld [vmem:[%s6898_s27 + $0xd0] sm:$0xff] }
  0x26   : > { %v398_v48 = vmax.f32 %v366_v41, 0.0  ;;  %v369_v54 = vadd.f32 %v6903_v4, %v331_v47  ;;  %v370_v57 = vadd.f32 %v6903_v4, %v332_v50  ;;  %v371_v62 = vadd.f32 %v6903_v4, %v333_v55 }
  0x27   : > { %v399_v53 = vmax.f32 %v367_v46, 0.0  ;;  %v400_v56 = vmax.f32 %v368_v49, 0.0  ;;  %v335_v63 = vmul.f32 %v6893_v3, %v297_v59  ;;  %v372_v1 = vadd.f32 %v6903_v4, %v334_v58  ;;  %v310_v46 = vld [vmem:[%s6898_s27 + $0xe0] sm:$0xff] }
  0x28   : > { %5771 = vmatmul.mubr.msk.f32.gmra.mrb[2].mxu0 %vm428_vm0, %v393_v29  ;;  %v401_v61 = vmax.f32 %v369_v54, 0.0  ;;  %v402_v0 = vmax.f32 %v370_v57, 0.0  ;;  %v336_v2 = vmul.f32 %v6893_v3, %v298_v60  ;;  %v403_v7 = vmax.f32 %v371_v62, 0.0  ;;  %v305_v29 = vld [vmem:[%s6898_s27 + $0xb8] sm:$0xff]  ;;  %v312_v54 = vld [vmem:[%s6898_s27 + $0xf0] sm:$0xff] }
  0x29   : > { %5773 = vmatprep.mubr.msk.f32.mxu0 %vm428_vm0, %v394_v32  ;;  %v373_v8 = vadd.f32 %v6903_v4, %v335_v63  ;;  %v337_v9 = vmul.f32 %v6893_v3, %v299_v5  ;;  %v404_v10 = vmax.f32 %v372_v1, 0.0  ;;  %v338_v12 = vmul.f32 %v6893_v3, %v300_v6 }
  0x2a   : > { %v374_v11 = vadd.f32 %v6903_v4, %v336_v2  ;;  %v339_v17 = vmul.f32 %v6893_v3, %v301_v13  ;;  %v340_v20 = vmul.f32 %v6893_v3, %v302_v14  ;;  %v341_v25 = vmul.f32 %v6893_v3, %v303_v21  ;;  %v892_v13 = vld [vmem:[%s8163_s5 + $0x10] sm:$0xff] }
  0x2b   : > { %v405_v15 = vmax.f32 %v373_v8, 0.0  ;;  %v375_v16 = vadd.f32 %v6903_v4, %v337_v9  ;;  %v376_v19 = vadd.f32 %v6903_v4, %v338_v12  ;;  %v342_v28 = vmul.f32 %v6893_v3, %v304_v22  ;;  %v891_v9 = vld [vmem:[%s8163_s5 + $0x8] sm:$0xff]  ;;  %v5254_v22 = vld [vmem:[%s8163_s5 + $0xa0] sm:$0xff] }
  0x2c   : > { %5774 = vmatmul.mubr.msk.f32.gmra.mrb[4].mxu0 %vm428_vm0, %v395_v37  ;;  %v406_v18 = vmax.f32 %v374_v11, 0.0  ;;  %v377_v24 = vadd.f32 %v6903_v4, %v339_v17  ;;  %v378_v27 = vadd.f32 %v6903_v4, %v340_v20  ;;  %v379_v32 = vadd.f32 %v6903_v4, %v341_v25  ;;  %v307_v37 = vld [vmem:[%s6898_s27 + $0xc8] sm:$0xff]  ;;  %v5218_v11 = vld [vmem:[%s8163_s5 + $0x80] sm:$0xff]  ;;  %v5220_v17 = vld [vmem:[%s8163_s5 + $0x90] sm:$0xff] }
  0x2d   : > { %5776 = vmatprep.mubr.msk.f32.mxu0 %vm428_vm0, %v396_v40  ;;  %v407_v23 = vmax.f32 %v375_v16, 0.0  ;;  %v408_v26 = vmax.f32 %v376_v19, 0.0  ;;  %v343_v33 = vmul.f32 %v6893_v3, %v305_v29  ;;  %v380_v35 = vadd.f32 %v6903_v4, %v342_v28  ;;  %v5219_v12 = vld [vmem:[%s8163_s5 + $0x88] sm:$0xff]  ;;  %v5110_v25 = vld [vmem:[%s8163_s5 + $0x20] sm:$0xff]  ;;  %v5112_v28 = vld [vmem:[%s8163_s5 + $0x30] sm:$0xff] }
  0x2e   : > { %v409_v31 = vmax.f32 %v377_v24, 0.0  ;;  %v410_v34 = vmax.f32 %v378_v27, 0.0  ;;  %v344_v36 = vmul.f32 %v6893_v3, %v306_v30  ;;  %v411_v39 = vmax.f32 %v379_v32, 0.0  ;;  %v5113_v29 = vld [vmem:[%s8163_s5 + $0x38] sm:$0xff] }
  0x2f   : > { %v381_v40 = vadd.f32 %v6903_v4, %v343_v33  ;;  %v345_v41 = vmul.f32 %v6893_v3, %v307_v37  ;;  %v412_v42 = vmax.f32 %v380_v35, 0.0  ;;  %v346_v44 = vmul.f32 %v6893_v3, %v308_v38  ;;  %v5146_v35 = vld [vmem:[%s8163_s5 + $0x40] sm:$0xff] }
  0x30   : > { %5777 = vmatmul.mubr.msk.f32.gmra.mrb[6].mxu0 %vm428_vm0, %v397_v45  ;;  %v382_v43 = vadd.f32 %v6903_v4, %v344_v36  ;;  %v309_v45 = vld [vmem:[%s6898_s27 + $0xd8] sm:$0xff]  ;;  %v348_v52 = vmul.f32 %v6893_v3, %v310_v46  ;;  %v350_v60 = vmul.f32 %v6893_v3, %v312_v54  ;;  %v6355_v14 = vpack.c.bf16 %v5219_v12, %v5218_v11  ;;  %v5147_v36 = vld [vmem:[%s8163_s5 + $0x48] sm:$0xff] }
  0x31   : > { %5779 = vmatprep.mubr.msk.f32.mxu0 %vm428_vm0, %v398_v48  ;;  %v413_v47 = vmax.f32 %v381_v40, 0.0  ;;  %v383_v48 = vadd.f32 %v6903_v4, %v345_v41  ;;  %v347_v49 = vmul.f32 %v6893_v3, %v309_v45  ;;  %v384_v51 = vadd.f32 %v6903_v4, %v346_v44 }
  0x32   : > { %v414_v50 = vmax.f32 %v382_v43, 0.0  ;;  %v386_v59 = vadd.f32 %v6903_v4, %v348_v52  ;;  %v388_v2 = vadd.f32 %v6903_v4, %v350_v60  ;;  %6356 = vmatprep.subr.bf16.mxu1 %v6355_v14  ;;  %v6335_v30 = vpack.c.bf16 %v5113_v29, %v5112_v28  ;;  %v5257_v52 = vld [vmem:[%s8163_s5 + $0xb8] sm:$0xff] }
  0x33   : > { %v415_v55 = vmax.f32 %v383_v48, 0.0  ;;  %v416_v58 = vmax.f32 %v384_v51, 0.0  ;;  %6358 = vmatpush3.bf16.msra.mxu1 %v6355_v14  ;;  %v7130_v38 = vpack.c.bf16 %v5147_v36, %v5146_v35  ;;  %v5256_v51 = vld [vmem:[%s8163_s5 + $0xb0] sm:$0xff] }
  0x34   : > { %5780 = vmatmul.mubr.msk.f32.gmra.mrb[8].mxu0 %vm428_vm0, %v399_v53  ;;  %v311_v53 = vld [vmem:[%s6898_s27 + $0xe8] sm:$0xff]  ;;  %v418_v1 = vmax.f32 %v386_v59, 0.0 }
  0x35   : > { %5782 = vmatprep.mubr.msk.f32.mxu0 %vm428_vm0, %v400_v56  ;;  %v385_v56 = vadd.f32 %v6903_v4, %v347_v49  ;;  %v349_v57 = vmul.f32 %v6893_v3, %v311_v53 }
  0x37   : > { %v417_v62 = vmax.f32 %v385_v56, 0.0  ;;  %v387_v63 = vadd.f32 %v6903_v4, %v349_v57 }
  0x38   : > { %5783 = vmatmul.mubr.msk.f32.gmra.mrb[10].mxu0 %vm428_vm0, %v401_v61  ;;  %v313_v61 = vld [vmem:[%s6898_s27 + $0xf8] sm:$0xff]  ;;  %s8103_s27 = scalar_lea.hbm %s8164_s6, %s5404_s17 }
  0x39   : > { %5785 = vmatprep.mubr.msk.f32.mxu0 %vm428_vm0, %v402_v0  ;;  %v351_v0 = vmul.f32 %v6893_v3, %v313_v61  ;;  %v419_v5 = vmax.f32 %v387_v63, 0.0  ;;  %v890_v3 = vld [vmem:[%s8163_s5] sm:$0xff]  ;;  %v6367_v61 = vpack.c.bf16 %v5257_v52, %v5256_v51 }
  0x3b   : > { %v389_v6 = vadd.f32 %v6903_v4, %v351_v0  ;;  %v6323_v4 = vpack.c.bf16 %v891_v9, %v890_v3  ;;  %v5290_v0 = vld [vmem:[%s8163_s5 + $0xc0] sm:$0xff] }
  0x3c   : > { %5786 = vmatmul.mubr.msk.f32.gmra.mrb[12].mxu0 %vm428_vm0, %v403_v7  ;;  %v420_v7 = vmax.f32 %v388_v2, 0.0 }
  0x3d   : > { %5788 = vmatprep.mubr.msk.f32.mxu0 %vm428_vm0, %v404_v10  ;;  %v421_v8 = vmax.f32 %v389_v6, 0.0  ;;  %v6789_v10 = vmov 0.0   ;;  %6324 = vmatprep.subr.bf16.mxu0 %v6323_v4 }
  0x3e   : > { %817 = vst.msk [vmem:[#allocation3] sm:$0x1] %vm816_vm2, %v6789_v10  ;;  %818 = vst.msk [vmem:[#allocation3 + $0x18] sm:$0x1] %vm816_vm2, %v6789_v10  ;;  %6326 = vmatpush3.bf16.msra.mxu0 %v6323_v4 }
  0x3f   : > { %853 = vst.msk [vmem:[#allocation3 + $0x1] sm:$0xff] %vm783_vm1, %v6789_v10  ;;  %854 = vst.msk [vmem:[#allocation3 + $0x9] sm:$0xff] %vm783_vm1, %v6789_v10 }
  0x40   : > { %5789 = vmatmul.mubr.msk.f32.gmra.mrb[14].mxu0 %vm428_vm0, %v405_v15  ;;  %819 = vst.msk [vmem:[#allocation3 + $0x30] sm:$0x1] %vm816_vm2, %v6789_v10  ;;  %820 = vst.msk [vmem:[#allocation3 + $0x48] sm:$0x1] %vm816_vm2, %v6789_v10  ;;  %v893_v15 = vld [vmem:[%s8163_s5 + $0x18] sm:$0xff] }
  0x41   : > { %5791 = vmatprep.mubr.msk.f32.mxu0 %vm428_vm0, %v406_v18  ;;  %821 = vst.msk [vmem:[#allocation3 + $0x60] sm:$0x1] %vm816_vm2, %v6789_v10  ;;  %822 = vst.msk [vmem:[#allocation3 + $0x78] sm:$0x1] %vm816_vm2, %v6789_v10  ;;  %v6327_v16 = vpack.c.bf16 %v893_v15, %v892_v13  ;;  %v5221_v18 = vld [vmem:[%s8163_s5 + $0x98] sm:$0xff] }
  0x42   : > { %823 = vst.msk [vmem:[#allocation3 + $0x90] sm:$0x1] %vm816_vm2, %v6789_v10  ;;  %824 = vst.msk [vmem:[#allocation3 + $0xa8] sm:$0x1] %vm816_vm2, %v6789_v10  ;;  %v6359_v20 = vpack.c.bf16 %v5221_v18, %v5220_v17 }
  0x43   : > { %825 = vst.msk [vmem:[#allocation3 + $0xc0] sm:$0x1] %vm816_vm2, %v6789_v10  ;;  %826 = vst.msk [vmem:[#allocation3 + $0xd8] sm:$0x1] %vm816_vm2, %v6789_v10  ;;  %6328 = vmatprep.subr.bf16.mxu0 %v6327_v16 }
  0x44   : > { %5792 = vmatmul.mubr.msk.f32.gmra.mrb[16].mxu0 %vm428_vm0, %v407_v23  ;;  %827 = vst.msk [vmem:[#allocation3 + $0xf0] sm:$0x1] %vm816_vm2, %v6789_v10  ;;  %828 = vst.msk [vmem:[#allocation3 + $0x108] sm:$0x1] %vm816_vm2, %v6789_v10  ;;  %6360 = vmatprep.subr.bf16.mxu1 %v6359_v20  ;;  %v5255_v23 = vld [vmem:[%s8163_s5 + $0xa8] sm:$0xff] }
  0x45   : > { %5794 = vmatprep.mubr.msk.f32.mxu0 %vm428_vm0, %v408_v26  ;;  %829 = vst.msk [vmem:[#allocation3 + $0x120] sm:$0x1] %vm816_vm2, %v6789_v10  ;;  %830 = vst.msk [vmem:[#allocation3 + $0x138] sm:$0x1] %vm816_vm2, %v6789_v10  ;;  %6330 = vmatpush3.bf16.msra.mxu0 %v6327_v16  ;;  %v6363_v24 = vpack.c.bf16 %v5255_v23, %v5254_v22  ;;  %v5111_v26 = vld [vmem:[%s8163_s5 + $0x28] sm:$0xff] }
  0x46   : > { %831 = vst.msk [vmem:[#allocation3 + $0x150] sm:$0x1] %vm816_vm2, %v6789_v10  ;;  %832 = vst.msk [vmem:[#allocation3 + $0x168] sm:$0x1] %vm816_vm2, %v6789_v10  ;;  %v858_v19 = vld [vmem:[#allocation3] sm:$0xff]  ;;  %v859_v21 = vld [vmem:[#allocation3 + $0x8] sm:$0xff]  ;;  %6362 = vmatpush3.bf16.msra.mxu1 %v6359_v20  ;;  %v6331_v27 = vpack.c.bf16 %v5111_v26, %v5110_v25 }
  0x47   : > { %833 = vst.msk [vmem:[#allocation3 + $0x180] sm:$0x1] %vm816_vm2, %v6789_v10  ;;  %834 = vst.msk [vmem:[#allocation3 + $0x198] sm:$0x1] %vm816_vm2, %v6789_v10  ;;  %6364 = vmatprep.subr.bf16.mxu1 %v6363_v24 }
  0x48   : > { %5795 = vmatmul.mubr.msk.f32.gmra.mrb[18].mxu0 %vm428_vm0, %v409_v31  ;;  %835 = vst.msk [vmem:[#allocation3 + $0x11] sm:$0x1] %vm816_vm2, %v6789_v10  ;;  %836 = vst.msk [vmem:[#allocation3 + $0x29] sm:$0x1] %vm816_vm2, %v6789_v10  ;;  %6332 = vmatprep.subr.bf16.mxu0 %v6331_v27  ;;  %v7120_v31 = vld [vmem:[%s8162_s4] ss:$0 sm:$0xff] }
  0x49   : > { %5797 = vmatprep.mubr.msk.f32.mxu0 %vm428_vm0, %v410_v34  ;;  %837 = vst.msk [vmem:[#allocation3 + $0x41] sm:$0x1] %vm816_vm2, %v6789_v10  ;;  %838 = vst.msk [vmem:[#allocation3 + $0x59] sm:$0x1] %vm816_vm2, %v6789_v10 }
  0x4a   : > { %839 = vst.msk [vmem:[#allocation3 + $0x71] sm:$0x1] %vm816_vm2, %v6789_v10  ;;  %840 = vst.msk [vmem:[#allocation3 + $0x89] sm:$0x1] %vm816_vm2, %v6789_v10 }
  0x4b   : > { %841 = vst.msk [vmem:[#allocation3 + $0xa1] sm:$0x1] %vm816_vm2, %v6789_v10  ;;  %842 = vst.msk [vmem:[#allocation3 + $0xb9] sm:$0x1] %vm816_vm2, %v6789_v10 }
  0x4c   : > { %5798 = vmatmul.mubr.msk.f32.gmra.mrb[20].mxu0 %vm428_vm0, %v411_v39  ;;  %843 = vst.msk [vmem:[#allocation3 + $0xd1] sm:$0x1] %vm816_vm2, %v6789_v10  ;;  %844 = vst.msk [vmem:[#allocation3 + $0xe9] sm:$0x1] %vm816_vm2, %v6789_v10 }
  0x4d   : > { %5800 = vmatprep.mubr.msk.f32.mxu0 %vm428_vm0, %v412_v42  ;;  %845 = vst.msk [vmem:[#allocation3 + $0x101] sm:$0x1] %vm816_vm2, %v6789_v10  ;;  %846 = vst.msk [vmem:[#allocation3 + $0x119] sm:$0x1] %vm816_vm2, %v6789_v10 }
  0x4e   : > { %847 = vst.msk [vmem:[#allocation3 + $0x131] sm:$0x1] %vm816_vm2, %v6789_v10  ;;  %848 = vst.msk [vmem:[#allocation3 + $0x149] sm:$0x1] %vm816_vm2, %v6789_v10 }
  0x4f   : > { %849 = vst.msk [vmem:[#allocation3 + $0x161] sm:$0x1] %vm816_vm2, %v6789_v10  ;;  %850 = vst.msk [vmem:[#allocation3 + $0x179] sm:$0x1] %vm816_vm2, %v6789_v10 }
  0x50   : > { %5801 = vmatmul.mubr.msk.f32.gmra.mrb[22].mxu0 %vm428_vm0, %v413_v47  ;;  %851 = vst.msk [vmem:[#allocation3 + $0x191] sm:$0x1] %vm816_vm2, %v6789_v10  ;;  %852 = vst.msk [vmem:[#allocation3 + $0x1a9] sm:$0x1] %vm816_vm2, %v6789_v10 }
  0x51   : > { %5803 = vmatprep.mubr.msk.f32.mxu0 %vm428_vm0, %v414_v50  ;;  %856 = vst.msk [vmem:[#allocation3 + $0x199] sm:$0xff] %vm783_vm1, %v6789_v10  ;;  %857 = vst.msk [vmem:[#allocation3 + $0x1a1] sm:$0xff] %vm783_vm1, %v6789_v10 }
  0x54   : > { %5804 = vmatmul.mubr.msk.f32.gmra.mrb[24].mxu0 %vm428_vm0, %v415_v55 }
  0x55   : > { %5806 = vmatprep.mubr.msk.f32.mxu0 %vm428_vm0, %v416_v58 }
  0x58   : > { %5807 = vmatmul.mubr.msk.f32.gmra.mrb[26].mxu0 %vm428_vm0, %v417_v62 }
  0x59   : > { %5809 = vmatprep.mubr.msk.f32.mxu0 %vm428_vm0, %v418_v1  ;;  %v5291_v1 = vld [vmem:[%s8163_s5 + $0xc8] sm:$0xff] }
  0x5a   : > { %v7175_v10 = vpack.c.bf16 %v5291_v1, %v5290_v0 }
  0x5c   : > { %5810 = vmatmul.mubr.msk.f32.gmra.mrb[28].mxu0 %vm428_vm0, %v419_v5 }
  0x5d   : > { %5812 = vmatprep.mubr.msk.f32.mxu0 %vm428_vm0, %v420_v7 }
  0x60   : > { %5813 = vmatmul.mubr.msk.f32.gmra.mrb[30].mxu0 %vm428_vm0, %v421_v8 }
  0x61   : > { %5823 = vmatprep.mubr.msk.f32.mxu0 %vm783_vm1, %v858_v19 }
  0x64   : > { %5824 = vmatmul.mubr.msk.f32.vlgmr.msra.gmra.mrb[32].mxu0 %vm783_vm1, %v859_v21 }
  0x65   : > { %6334 = vmatpush3.bf16.msra.mxu0 %v6331_v27 }
  0x66   : > { %6336 = vmatprep.subr.bf16.mxu0 %v6335_v30 }
  0x69   : > { %6338 = vmatpush3.bf16.msra.mxu0 %v6335_v30 }
  0x6a   : > { %6340 = vmatprep.subr.bf16.mxu0 %v7130_v38 }
  0xf7   : > { %v5769_v32 = vpop.f32.mrb[0].mxu0 }
  0xf8   : > { %v597_v33 = vadd.f32 %v5769_v32, %v7120_v31  ;;  %v591_v34 = vpop.f32.mrb[1].mxu0 }
  0xf9   : > { %v592_v37 = vadd.f32 %v7120_v31, %v591_v34 }
  0xfa   : > { %v751_v39 = vmax.f32 %v597_v33, 0.0 }
  0xfb   : > { %v750_v40 = vmax.f32 %v592_v37, 0.0  ;;  %v5772_v41 = vpop.f32.mrb[2].mxu0 }
  0xfc   : > { %785 = vst.msk [vmem:[#allocation3 + $0x21] sm:$0xff] %vm783_vm1, %v751_v39  ;;  %v607_v42 = vadd.f32 %v5772_v41, %v7120_v31  ;;  %v601_v43 = vpop.f32.mrb[3].mxu0 }
  0xfd   : > { %784 = vst.msk [vmem:[#allocation3 + $0x19] sm:$0xff] %vm783_vm1, %v750_v40  ;;  %v602_v44 = vadd.f32 %v7120_v31, %v601_v43 }
  0xfe   : > { %v753_v45 = vmax.f32 %v607_v42, 0.0 }
  0xff   : > { %v752_v46 = vmax.f32 %v602_v44, 0.0  ;;  %v5775_v47 = vpop.f32.mrb[4].mxu0 }
 0x100   : > { %787 = vst.msk [vmem:[#allocation3 + $0x39] sm:$0xff] %vm783_vm1, %v753_v45  ;;  %v617_v48 = vadd.f32 %v5775_v47, %v7120_v31  ;;  %v611_v49 = vpop.f32.mrb[5].mxu0 }
 0x101   : > { %786 = vst.msk [vmem:[#allocation3 + $0x31] sm:$0xff] %vm783_vm1, %v752_v46  ;;  %v612_v50 = vadd.f32 %v7120_v31, %v611_v49 }
 0x102   : > { %v755_v53 = vmax.f32 %v617_v48, 0.0 }
 0x103   : > { %v754_v54 = vmax.f32 %v612_v50, 0.0  ;;  %v5778_v55 = vpop.f32.mrb[6].mxu0  ;;  %v7156_v63 = vld [vmem:[#allocation3 + $0x21] sm:$0xff] }
 0x104   : > { %789 = vst.msk [vmem:[#allocation3 + $0x51] sm:$0xff] %vm783_vm1, %v755_v53  ;;  %v627_v56 = vadd.f32 %v5778_v55, %v7120_v31  ;;  %v621_v57 = vpop.f32.mrb[7].mxu0  ;;  %v860_v58 = vld [vmem:[#allocation3 + $0x18] sm:$0xff]  ;;  %v861_v60 = vld [vmem:[#allocation3 + $0x20] sm:$0xff] }
 0x105   : > { %v7149_v59 = vld [vmem:[#allocation3 + $0x19] sm:$0xff]  ;;  %788 = vst.msk [vmem:[#allocation3 + $0x49] sm:$0xff] %vm783_vm1, %v754_v54  ;;  %v622_v62 = vadd.f32 %v7120_v31, %v621_v57  ;;  %5826 = vmatprep.mubr.msk.f32.mxu0 %vm783_vm1, %v860_v58 }
 0x106   : > { %6047 = vmatprep.mubr.msk.f32.mxu1 %vm783_vm1, %v7149_v59  ;;  %v757_v2 = vmax.f32 %v627_v56, 0.0  ;;  %5827 = vmatmul.mubr.msk.f32.gmra.mrb[34].mxu0 %vm783_vm1, %v861_v60 }
 0x107   : > { %6048 = vmatmul.mubr.msk.f32.vlgmr.msra.gmra.mrb[0].mxu1 %vm783_vm1, %v7156_v63  ;;  %v756_v5 = vmax.f32 %v622_v62, 0.0  ;;  %v5781_v6 = vpop.f32.mrb[8].mxu0  ;;  %v7183_v12 = vld [vmem:[#allocation3 + $0x39] sm:$0xff] }
 0x108   : > { %6366 = vmatpush3.bf16.msra.mxu1 %v6363_v24  ;;  %791 = vst.msk [vmem:[#allocation3 + $0x69] sm:$0xff] %vm783_vm1, %v757_v2  ;;  %v637_v7 = vadd.f32 %v5781_v6, %v7120_v31  ;;  %v631_v8 = vpop.f32.mrb[9].mxu0  ;;  %v7169_v3 = vld [vmem:[#allocation3 + $0x30] sm:$0xff]  ;;  %v7173_v4 = vld [vmem:[#allocation3 + $0x38] sm:$0xff] }
 0x109   : > { %v7171_v9 = vld [vmem:[#allocation3 + $0x31] sm:$0xff]  ;;  %6368 = vmatprep.subr.bf16.mxu1 %v6367_v61  ;;  %790 = vst.msk [vmem:[#allocation3 + $0x61] sm:$0xff] %vm783_vm1, %v756_v5  ;;  %v632_v11 = vadd.f32 %v7120_v31, %v631_v8  ;;  %5829 = vmatprep.mubr.msk.f32.mxu0 %vm783_vm1, %v7169_v3 }
 0x10a   : > { %6050 = vmatprep.mubr.msk.f32.mxu1 %vm783_vm1, %v7171_v9  ;;  %v759_v13 = vmax.f32 %v637_v7, 0.0  ;;  %5830 = vmatmul.mubr.msk.f32.gmra.mrb[36].mxu0 %vm783_vm1, %v7173_v4 }
 0x10b   : > { %6051 = vmatmul.mubr.msk.f32.gmra.mrb[2].mxu1 %vm783_vm1, %v7183_v12  ;;  %v758_v14 = vmax.f32 %v632_v11, 0.0  ;;  %v5784_v15 = vpop.f32.mrb[10].mxu0  ;;  %v7204_v22 = vld [vmem:[#allocation3 + $0x51] sm:$0xff] }
 0x10c   : > { %6370 = vmatpush3.bf16.msra.mxu1 %v6367_v61  ;;  %793 = vst.msk [vmem:[#allocation3 + $0x81] sm:$0xff] %vm783_vm1, %v759_v13  ;;  %v647_v16 = vadd.f32 %v5784_v15, %v7120_v31  ;;  %v641_v17 = vpop.f32.mrb[11].mxu0  ;;  %v7191_v18 = vld [vmem:[#allocation3 + $0x48] sm:$0xff]  ;;  %v7195_v20 = vld [vmem:[#allocation3 + $0x50] sm:$0xff] }
 0x10d   : > { %v7193_v19 = vld [vmem:[#allocation3 + $0x49] sm:$0xff]  ;;  %6372 = vmatprep.subr.bf16.mxu1 %v7175_v10  ;;  %792 = vst.msk [vmem:[#allocation3 + $0x79] sm:$0xff] %vm783_vm1, %v758_v14  ;;  %v642_v21 = vadd.f32 %v7120_v31, %v641_v17  ;;  %5832 = vmatprep.mubr.msk.f32.mxu0 %vm783_vm1, %v7191_v18 }
 0x10e   : > { %6053 = vmatprep.mubr.msk.f32.mxu1 %vm783_vm1, %v7193_v19  ;;  %v761_v23 = vmax.f32 %v647_v16, 0.0  ;;  %5833 = vmatmul.mubr.msk.f32.gmra.mrb[38].mxu0 %vm783_vm1, %v7195_v20 }
 0x10f   : > { %6054 = vmatmul.mubr.msk.f32.gmra.mrb[4].mxu1 %vm783_vm1, %v7204_v22  ;;  %v760_v24 = vmax.f32 %v642_v21, 0.0  ;;  %v5787_v25 = vpop.f32.mrb[12].mxu0  ;;  %v7224_v33 = vld [vmem:[#allocation3 + $0x69] sm:$0xff] }
 0x110   : > { %795 = vst.msk [vmem:[#allocation3 + $0x99] sm:$0xff] %vm783_vm1, %v761_v23  ;;  %v657_v26 = vadd.f32 %v5787_v25, %v7120_v31  ;;  %v651_v27 = vpop.f32.mrb[13].mxu0  ;;  %v7212_v28 = vld [vmem:[#allocation3 + $0x60] sm:$0xff]  ;;  %v7216_v30 = vld [vmem:[#allocation3 + $0x68] sm:$0xff]  ;;  %8208 = vst [vmem:[#allocation7_spill] sm:$0xff] %v7224_v33 }
 0x111   : > { %v7214_v29 = vld [vmem:[#allocation3 + $0x61] sm:$0xff]  ;;  %794 = vst.msk [vmem:[#allocation3 + $0x91] sm:$0xff] %vm783_vm1, %v760_v24  ;;  %v652_v32 = vadd.f32 %v7120_v31, %v651_v27  ;;  %5835 = vmatprep.mubr.msk.f32.mxu0 %vm783_vm1, %v7212_v28 }
 0x112   : > { %6056 = vmatprep.mubr.msk.f32.mxu1 %vm783_vm1, %v7214_v29  ;;  %v763_v34 = vmax.f32 %v657_v26, 0.0  ;;  %5836 = vmatmul.mubr.msk.f32.gmra.mrb[40].mxu0 %vm783_vm1, %v7216_v30 }
 0x113   : > { %6057 = vmatmul.mubr.msk.f32.gmra.mrb[6].mxu1 %vm783_vm1, %v7224_v33  ;;  %v762_v35 = vmax.f32 %v652_v32, 0.0  ;;  %v5790_v36 = vpop.f32.mrb[14].mxu0  ;;  %v7244_v44 = vld [vmem:[#allocation3 + $0x81] sm:$0xff] }
 0x114   : > { %797 = vst.msk [vmem:[#allocation3 + $0xb1] sm:$0xff] %vm783_vm1, %v763_v34  ;;  %v667_v37 = vadd.f32 %v5790_v36, %v7120_v31  ;;  %v661_v39 = vpop.f32.mrb[15].mxu0  ;;  %v7232_v40 = vld [vmem:[#allocation3 + $0x78] sm:$0xff]  ;;  %v7236_v42 = vld [vmem:[#allocation3 + $0x80] sm:$0xff]  ;;  %8210 = vst [vmem:[#allocation9_spill] sm:$0xff] %v7244_v44 }
 0x115   : > { %v7234_v41 = vld [vmem:[#allocation3 + $0x79] sm:$0xff]  ;;  %796 = vst.msk [vmem:[#allocation3 + $0xa9] sm:$0xff] %vm783_vm1, %v762_v35  ;;  %v662_v43 = vadd.f32 %v7120_v31, %v661_v39  ;;  %5838 = vmatprep.mubr.msk.f32.mxu0 %vm783_vm1, %v7232_v40 }
 0x116   : > { %8209 = vst [vmem:[#allocation8_spill] sm:$0xff] %v7234_v41  ;;  %6059 = vmatprep.mubr.msk.f32.mxu1 %vm783_vm1, %v7234_v41  ;;  %v765_v45 = vmax.f32 %v667_v37, 0.0  ;;  %5839 = vmatmul.mubr.msk.f32.gmra.mrb[42].mxu0 %vm783_vm1, %v7236_v42 }
 0x117   : > { %6060 = vmatmul.mubr.msk.f32.gmra.mrb[8].mxu1 %vm783_vm1, %v7244_v44  ;;  %v764_v46 = vmax.f32 %v662_v43, 0.0  ;;  %v5793_v47 = vpop.f32.mrb[16].mxu0  ;;  %v7264_v54 = vld [vmem:[#allocation3 + $0x99] sm:$0xff] }
 0x118   : > { %799 = vst.msk [vmem:[#allocation3 + $0xc9] sm:$0xff] %vm783_vm1, %v765_v45  ;;  %v677_v48 = vadd.f32 %v5793_v47, %v7120_v31  ;;  %v671_v49 = vpop.f32.mrb[17].mxu0  ;;  %v7252_v50 = vld [vmem:[#allocation3 + $0x90] sm:$0xff]  ;;  %v7256_v52 = vld [vmem:[#allocation3 + $0x98] sm:$0xff]  ;;  %8212 = vst [vmem:[#allocation11_spill] sm:$0xff] %v7264_v54 }
 0x119   : > { %v7254_v51 = vld [vmem:[#allocation3 + $0x91] sm:$0xff]  ;;  %798 = vst.msk [vmem:[#allocation3 + $0xc1] sm:$0xff] %vm783_vm1, %v764_v46  ;;  %v672_v53 = vadd.f32 %v7120_v31, %v671_v49  ;;  %5841 = vmatprep.mubr.msk.f32.mxu0 %vm783_vm1, %v7252_v50 }
 0x11a   : > { %8211 = vst [vmem:[#allocation10_spill] sm:$0xff] %v7254_v51  ;;  %6062 = vmatprep.mubr.msk.f32.mxu1 %vm783_vm1, %v7254_v51  ;;  %v767_v55 = vmax.f32 %v677_v48, 0.0  ;;  %5842 = vmatmul.mubr.msk.f32.gmra.mrb[44].mxu0 %vm783_vm1, %v7256_v52 }
 0x11b   : > { %6063 = vmatmul.mubr.msk.f32.gmra.mrb[10].mxu1 %vm783_vm1, %v7264_v54  ;;  %v766_v56 = vmax.f32 %v672_v53, 0.0  ;;  %v5796_v57 = vpop.f32.mrb[18].mxu0  ;;  %v7284_v2 = vld [vmem:[#allocation3 + $0xb1] sm:$0xff] }
 0x11c   : > { %801 = vst.msk [vmem:[#allocation3 + $0xe1] sm:$0xff] %vm783_vm1, %v767_v55  ;;  %v687_v58 = vadd.f32 %v5796_v57, %v7120_v31  ;;  %v681_v60 = vpop.f32.mrb[19].mxu0  ;;  %v7272_v61 = vld [vmem:[#allocation3 + $0xa8] sm:$0xff]  ;;  %v7276_v0 = vld [vmem:[#allocation3 + $0xb0] sm:$0xff]  ;;  %8214 = vst [vmem:[#allocation13_spill] sm:$0xff] %v7284_v2 }
 0x11d   : > { %v7274_v62 = vld [vmem:[#allocation3 + $0xa9] sm:$0xff]  ;;  %800 = vst.msk [vmem:[#allocation3 + $0xd9] sm:$0xff] %vm783_vm1, %v766_v56  ;;  %v682_v1 = vadd.f32 %v7120_v31, %v681_v60  ;;  %5844 = vmatprep.mubr.msk.f32.mxu0 %vm783_vm1, %v7272_v61 }
 0x11e   : > { %8213 = vst [vmem:[#allocation12_spill] sm:$0xff] %v7274_v62  ;;  %6065 = vmatprep.mubr.msk.f32.mxu1 %vm783_vm1, %v7274_v62  ;;  %v769_v5 = vmax.f32 %v687_v58, 0.0  ;;  %5845 = vmatmul.mubr.msk.f32.gmra.mrb[46].mxu0 %vm783_vm1, %v7276_v0 }
 0x11f   : > { %6066 = vmatmul.mubr.msk.f32.gmra.mrb[12].mxu1 %vm783_vm1, %v7284_v2  ;;  %v768_v6 = vmax.f32 %v682_v1, 0.0  ;;  %v5799_v7 = vpop.f32.mrb[20].mxu0  ;;  %v7304_v17 = vld [vmem:[#allocation3 + $0xc9] sm:$0xff] }
 0x120   : > { %803 = vst.msk [vmem:[#allocation3 + $0xf9] sm:$0xff] %vm783_vm1, %v769_v5  ;;  %v697_v8 = vadd.f32 %v5799_v7, %v7120_v31  ;;  %v691_v11 = vpop.f32.mrb[21].mxu0  ;;  %v7292_v13 = vld [vmem:[#allocation3 + $0xc0] sm:$0xff]  ;;  %v7296_v15 = vld [vmem:[#allocation3 + $0xc8] sm:$0xff]  ;;  %8216 = vst [vmem:[#allocation15_spill] sm:$0xff] %v7304_v17 }
 0x121   : > { %v7294_v14 = vld [vmem:[#allocation3 + $0xc1] sm:$0xff]  ;;  %802 = vst.msk [vmem:[#allocation3 + $0xf1] sm:$0xff] %vm783_vm1, %v768_v6  ;;  %v692_v16 = vadd.f32 %v7120_v31, %v691_v11  ;;  %5847 = vmatprep.mubr.msk.f32.mxu0 %vm783_vm1, %v7292_v13 }
 0x122   : > { %8215 = vst [vmem:[#allocation14_spill] sm:$0xff] %v7294_v14  ;;  %6068 = vmatprep.mubr.msk.f32.mxu1 %vm783_vm1, %v7294_v14  ;;  %v771_v21 = vmax.f32 %v697_v8, 0.0  ;;  %5848 = vmatmul.mubr.msk.f32.gmra.mrb[48].mxu0 %vm783_vm1, %v7296_v15 }
 0x123   : > { %6069 = vmatmul.mubr.msk.f32.gmra.mrb[14].mxu1 %vm783_vm1, %v7304_v17  ;;  %v770_v23 = vmax.f32 %v692_v16, 0.0  ;;  %v5802_v24 = vpop.f32.mrb[22].mxu0  ;;  %v7324_v36 = vld [vmem:[#allocation3 + $0xe1] sm:$0xff] }
 0x124   : > { %805 = vst.msk [vmem:[#allocation3 + $0x111] sm:$0xff] %vm783_vm1, %v771_v21  ;;  %v707_v25 = vadd.f32 %v5802_v24, %v7120_v31  ;;  %v701_v26 = vpop.f32.mrb[23].mxu0  ;;  %v7312_v27 = vld [vmem:[#allocation3 + $0xd8] sm:$0xff]  ;;  %v7316_v34 = vld [vmem:[#allocation3 + $0xe0] sm:$0xff]  ;;  %8218 = vst [vmem:[#allocation17_spill] sm:$0xff] %v7324_v36 }
 0x125   : > { %v7314_v32 = vld [vmem:[#allocation3 + $0xd9] sm:$0xff]  ;;  %804 = vst.msk [vmem:[#allocation3 + $0x109] sm:$0xff] %vm783_vm1, %v770_v23  ;;  %v702_v35 = vadd.f32 %v7120_v31, %v701_v26  ;;  %5850 = vmatprep.mubr.msk.f32.mxu0 %vm783_vm1, %v7312_v27 }
 0x126   : > { %8217 = vst [vmem:[#allocation16_spill] sm:$0xff] %v7314_v32  ;;  %6071 = vmatprep.mubr.msk.f32.mxu1 %vm783_vm1, %v7314_v32  ;;  %v773_v37 = vmax.f32 %v707_v25, 0.0  ;;  %5851 = vmatmul.mubr.msk.f32.gmra.mrb[50].mxu0 %vm783_vm1, %v7316_v34 }
 0x127   : > { %6072 = vmatmul.mubr.msk.f32.gmra.mrb[16].mxu1 %vm783_vm1, %v7324_v36  ;;  %v772_v39 = vmax.f32 %v702_v35, 0.0  ;;  %v5805_v43 = vpop.f32.mrb[24].mxu0  ;;  %v7344_v55 = vld [vmem:[#allocation3 + $0xf9] sm:$0xff] }
 0x128   : > { %807 = vst.msk [vmem:[#allocation3 + $0x129] sm:$0xff] %vm783_vm1, %v773_v37  ;;  %v717_v45 = vadd.f32 %v5805_v43, %v7120_v31  ;;  %v711_v46 = vpop.f32.mrb[25].mxu0  ;;  %v7332_v47 = vld [vmem:[#allocation3 + $0xf0] sm:$0xff]  ;;  %v7336_v49 = vld [vmem:[#allocation3 + $0xf8] sm:$0xff]  ;;  %8220 = vst [vmem:[#allocation19_spill] sm:$0xff] %v7344_v55 }
 0x129   : > { %v7334_v48 = vld [vmem:[#allocation3 + $0xf1] sm:$0xff]  ;;  %806 = vst.msk [vmem:[#allocation3 + $0x121] sm:$0xff] %vm783_vm1, %v772_v39  ;;  %v712_v53 = vadd.f32 %v7120_v31, %v711_v46  ;;  %5853 = vmatprep.mubr.msk.f32.mxu0 %vm783_vm1, %v7332_v47 }
 0x12a   : > { %8219 = vst [vmem:[#allocation18_spill] sm:$0xff] %v7334_v48  ;;  %6074 = vmatprep.mubr.msk.f32.mxu1 %vm783_vm1, %v7334_v48  ;;  %v775_v56 = vmax.f32 %v717_v45, 0.0  ;;  %5854 = vmatmul.mubr.msk.f32.gmra.mrb[52].mxu0 %vm783_vm1, %v7336_v49 }
 0x12b   : > { %6075 = vmatmul.mubr.msk.f32.gmra.mrb[18].mxu1 %vm783_vm1, %v7344_v55  ;;  %v774_v57 = vmax.f32 %v712_v53, 0.0  ;;  %v5808_v58 = vpop.f32.mrb[26].mxu0  ;;  %v7364_v11 = vld [vmem:[#allocation3 + $0x111] sm:$0xff] }
 0x12c   : > { %809 = vst.msk [vmem:[#allocation3 + $0x141] sm:$0xff] %vm783_vm1, %v775_v56  ;;  %v727_v60 = vadd.f32 %v5808_v58, %v7120_v31  ;;  %v721_v1 = vpop.f32.mrb[27].mxu0  ;;  %v7352_v5 = vld [vmem:[#allocation3 + $0x108] sm:$0xff]  ;;  %v7356_v7 = vld [vmem:[#allocation3 + $0x110] sm:$0xff]  ;;  %8222 = vst [vmem:[#allocation21_spill] sm:$0xff] %v7364_v11 }
 0x12d   : > { %v7354_v6 = vld [vmem:[#allocation3 + $0x109] sm:$0xff]  ;;  %808 = vst.msk [vmem:[#allocation3 + $0x139] sm:$0xff] %vm783_vm1, %v774_v57  ;;  %v722_v8 = vadd.f32 %v7120_v31, %v721_v1  ;;  %5856 = vmatprep.mubr.msk.f32.mxu0 %vm783_vm1, %v7352_v5 }
 0x12e   : > { %8221 = vst [vmem:[#allocation20_spill] sm:$0xff] %v7354_v6  ;;  %6077 = vmatprep.mubr.msk.f32.mxu1 %vm783_vm1, %v7354_v6  ;;  %v777_v16 = vmax.f32 %v727_v60, 0.0  ;;  %5857 = vmatmul.mubr.msk.f32.gmra.mrb[54].mxu0 %vm783_vm1, %v7356_v7 }
 0x12f   : > { %6078 = vmatmul.mubr.msk.f32.gmra.mrb[20].mxu1 %vm783_vm1, %v7364_v11  ;;  %v776_v21 = vmax.f32 %v722_v8, 0.0  ;;  %v5811_v23 = vpop.f32.mrb[28].mxu0  ;;  %v7384_v43 = vld [vmem:[#allocation3 + $0x129] sm:$0xff] }
 0x130   : > { %811 = vst.msk [vmem:[#allocation3 + $0x159] sm:$0xff] %vm783_vm1, %v777_v16  ;;  %v737_v24 = vadd.f32 %v5811_v23, %v7120_v31  ;;  %v731_v25 = vpop.f32.mrb[29].mxu0  ;;  %v7372_v26 = vld [vmem:[#allocation3 + $0x120] sm:$0xff]  ;;  %v7376_v37 = vld [vmem:[#allocation3 + $0x128] sm:$0xff]  ;;  %8224 = vst [vmem:[#allocation23_spill] sm:$0xff] %v7384_v43 }
 0x131   : > { %v7374_v35 = vld [vmem:[#allocation3 + $0x121] sm:$0xff]  ;;  %810 = vst.msk [vmem:[#allocation3 + $0x151] sm:$0xff] %vm783_vm1, %v776_v21  ;;  %v732_v39 = vadd.f32 %v7120_v31, %v731_v25  ;;  %5859 = vmatprep.mubr.msk.f32.mxu0 %vm783_vm1, %v7372_v26 }
 0x132   : > { %8223 = vst [vmem:[#allocation22_spill] sm:$0xff] %v7374_v35  ;;  %6080 = vmatprep.mubr.msk.f32.mxu1 %vm783_vm1, %v7374_v35  ;;  %v779_v45 = vmax.f32 %v737_v24, 0.0  ;;  %5860 = vmatmul.mubr.msk.f32.gmra.mrb[56].mxu0 %vm783_vm1, %v7376_v37 }
 0x133   : > { %6081 = vmatmul.mubr.msk.f32.gmra.mrb[22].mxu1 %vm783_vm1, %v7384_v43  ;;  %v778_v46 = vmax.f32 %v732_v39, 0.0  ;;  %v5814_v53 = vpop.f32.mrb[30].mxu0  ;;  %v7404_v16 = vld [vmem:[#allocation3 + $0x141] sm:$0xff] }
 0x134   : > { %813 = vst.msk [vmem:[#allocation3 + $0x171] sm:$0xff] %vm783_vm1, %v779_v45  ;;  %v747_v56 = vadd.f32 %v5814_v53, %v7120_v31  ;;  %v741_v57 = vpop.f32.mrb[31].mxu0  ;;  %v7392_v58 = vld [vmem:[#allocation3 + $0x138] sm:$0xff]  ;;  %v7396_v1 = vld [vmem:[#allocation3 + $0x140] sm:$0xff]  ;;  %8228 = vst [vmem:[#allocation27_spill] sm:$0xff] %v7404_v16 }
 0x135   : > { %8225 = vst [vmem:[#allocation24_spill] sm:$0xff] %v7392_v58  ;;  %v7394_v60 = vld [vmem:[#allocation3 + $0x139] sm:$0xff]  ;;  %8227 = vst [vmem:[#allocation26_spill] sm:$0xff] %v7396_v1  ;;  %v742_v8 = vadd.f32 %v7120_v31, %v741_v57  ;;  %5862 = vmatprep.mubr.msk.f32.mxu0 %vm783_vm1, %v7392_v58  ;;  %v1247_v45 = vld [vmem:[#allocation3 + $0x1] sm:$0xff] }
 0x136   : > { %8226 = vst [vmem:[#allocation25_spill] sm:$0xff] %v7394_v60  ;;  %812 = vst.msk [vmem:[#allocation3 + $0x169] sm:$0xff] %vm783_vm1, %v778_v46  ;;  %6083 = vmatprep.mubr.msk.f32.mxu1 %vm783_vm1, %v7394_v60  ;;  %v781_v21 = vmax.f32 %v747_v56, 0.0  ;;  %5863 = vmatmul.mubr.msk.f32.gmra.mrb[58].mxu0 %vm783_vm1, %v7396_v1  ;;  %v7473_v58 = vld [vmem:[#allocation3 + $0x22] sm:$0xff] }
 0x137   : > { %6084 = vmatmul.mubr.msk.f32.gmra.mrb[24].mxu1 %vm783_vm1, %v7404_v16  ;;  %v780_v23 = vmax.f32 %v742_v8, 0.0  ;;  %v7422_v39 = vld [vmem:[#allocation3 + $0x159] sm:$0xff]  ;;  %v5148_v8 = vld [vmem:[%s8163_s5 + $0x50] sm:$0xff] }
 0x138   : > { %815 = vst.msk [vmem:[#allocation3 + $0x189] sm:$0xff] %vm783_vm1, %v781_v21  ;;  %v7411_v24 = vld [vmem:[#allocation3 + $0x150] sm:$0xff]  ;;  %v7415_v25 = vld [vmem:[#allocation3 + $0x158] sm:$0xff]  ;;  %8232 = vst [vmem:[#allocation31_spill] sm:$0xff] %v7422_v39 }
 0x139   : > { %8229 = vst [vmem:[#allocation28_spill] sm:$0xff] %v7411_v24  ;;  %v7413_v31 = vld [vmem:[#allocation3 + $0x151] sm:$0xff]  ;;  %8231 = vst [vmem:[#allocation30_spill] sm:$0xff] %v7415_v25  ;;  %5865 = vmatprep.mubr.msk.f32.mxu0 %vm783_vm1, %v7411_v24 }
 0x13a   : > { %8230 = vst [vmem:[#allocation29_spill] sm:$0xff] %v7413_v31  ;;  %814 = vst.msk [vmem:[#allocation3 + $0x181] sm:$0xff] %vm783_vm1, %v780_v23  ;;  %6086 = vmatprep.mubr.msk.f32.mxu1 %vm783_vm1, %v7413_v31  ;;  %5866 = vmatmul.mubr.msk.f32.gmra.mrb[60].mxu0 %vm783_vm1, %v7415_v25  ;;  %v5149_v21 = vld [vmem:[%s8163_s5 + $0x58] sm:$0xff]  ;;  %v1248_v23 = vld [vmem:[#allocation3 + $0x9] sm:$0xff] }
 0x13b   : > { %6087 = vmatmul.mubr.msk.f32.gmra.mrb[26].mxu1 %vm783_vm1, %v7422_v39  ;;  %v7438_v57 = vld [vmem:[#allocation3 + $0x171] sm:$0xff]  ;;  %v6343_v1 = vpack.c.bf16 %v5149_v21, %v5148_v8  ;;  %v5182_v8 = vld [vmem:[%s8163_s5 + $0x60] sm:$0xff]  ;;  %v5183_v21 = vld [vmem:[%s8163_s5 + $0x68] sm:$0xff] }
 0x13c   : > { %8236 = vst [vmem:[#allocation35_spill] sm:$0xff] %v7438_v57  ;;  %v5292_v25 = vld [vmem:[%s8163_s5 + $0xd0] sm:$0xff]  ;;  %v5293_v24 = vld [vmem:[%s8163_s5 + $0xd8] sm:$0xff] }
 0x13d   : > { %v7428_v46 = vld [vmem:[#allocation3 + $0x168] sm:$0xff]  ;;  %v7432_v56 = vld [vmem:[#allocation3 + $0x170] sm:$0xff] }
 0x13e   : > { %8233 = vst [vmem:[#allocation32_spill] sm:$0xff] %v7428_v46  ;;  %v7430_v53 = vld [vmem:[#allocation3 + $0x169] sm:$0xff]  ;;  %8235 = vst [vmem:[#allocation34_spill] sm:$0xff] %v7432_v56  ;;  %5868 = vmatprep.mubr.msk.f32.mxu0 %vm783_vm1, %v7428_v46 }
 0x13f   : > { %8234 = vst [vmem:[#allocation33_spill] sm:$0xff] %v7430_v53  ;;  %6089 = vmatprep.mubr.msk.f32.mxu1 %vm783_vm1, %v7430_v53  ;;  %5869 = vmatmul.mubr.msk.f32.gmra.mrb[62].mxu0 %vm783_vm1, %v7432_v56  ;;  %v7455_v56 = vld [vmem:[#allocation3 + $0x189] sm:$0xff] }
 0x140   : > { %6090 = vmatmul.mubr.msk.f32.gmra.mrb[28].mxu1 %vm783_vm1, %v7438_v57  ;;  %5879 = vmatprep.mubr.msk.f32.mxu0 %vm783_vm1, %v1247_v45  ;;  %8238 = vst [vmem:[#allocation37_spill] sm:$0xff] %v7455_v56  ;;  %v7466_v45 = vld [vmem:[#allocation3 + $0x1a] sm:$0xff] }
 0x141   : > { %v7451_v46 = vld [vmem:[#allocation3 + $0x181] sm:$0xff] }
 0x142   : > { %8237 = vst [vmem:[#allocation36_spill] sm:$0xff] %v7451_v46  ;;  %6092 = vmatprep.mubr.msk.f32.mxu1 %vm783_vm1, %v7451_v46  ;;  %v6375_v46 = vpack.c.bf16 %v5293_v24, %v5292_v25  ;;  %v7494_v24 = vld [vmem:[#allocation3 + $0x32] sm:$0xff]  ;;  %v7500_v25 = vld [vmem:[#allocation3 + $0x3a] sm:$0xff] }
 0x143   : > { %5880 = vmatmul.mubr.msk.f32.vlgmr.msra.gmra.mrb[32].mxu0 %vm783_vm1, %v1248_v23 }
 0x144   : > { %6093 = vmatmul.mubr.msk.f32.gmra.mrb[30].mxu1 %vm783_vm1, %v7455_v56  ;;  %5882 = vmatprep.mubr.msk.f32.mxu0 %vm783_vm1, %v7149_v59  ;;  %v5327_v59 = vld [vmem:[%s8163_s5 + $0xe8] sm:$0xff] }
 0x145   : > { %6103 = vmatprep.mubr.msk.f32.mxu1 %vm783_vm1, %v7466_v45  ;;  %6342 = vmatpush3.bf16.msra.mxu0 %v7130_v38  ;;  %v5326_v38 = vld [vmem:[%s8163_s5 + $0xe0] sm:$0xff]  ;;  %v7576_v56 = vld [vmem:[#allocation3 + $0xca] sm:$0xff] }
 0x146   : > { %6344 = vmatprep.subr.bf16.mxu0 %v6343_v1  ;;  %v7502_v23 = vpack.c.bf16 %v5327_v59, %v5326_v38  ;;  %v7564_v38 = vld [vmem:[#allocation3 + $0xb2] sm:$0xff]  ;;  %v7570_v59 = vld [vmem:[#allocation3 + $0xc2] sm:$0xff] }
 0x147   : > { %5883 = vmatmul.mubr.msk.f32.gmra.mrb[34].mxu0 %vm783_vm1, %v7156_v63  ;;  %v7498_v63 = vpack.c.bf16 %v5183_v21, %v5182_v8  ;;  %v7552_v8 = vld [vmem:[#allocation3 + $0x9a] sm:$0xff]  ;;  %v7558_v21 = vld [vmem:[#allocation3 + $0xaa] sm:$0xff] }
 0x148   : > { %6104 = vmatmul.mubr.msk.f32.vlgmr.msra.gmra.mrb[0].mxu1 %vm783_vm1, %v7473_v58  ;;  %5885 = vmatprep.mubr.msk.f32.mxu0 %vm783_vm1, %v7171_v9  ;;  %v7508_v9 = vld [vmem:[#allocation3 + $0x4a] sm:$0xff] }
 0x149   : > { %6374 = vmatpush3.bf16.msra.mxu1 %v7175_v10  ;;  %6106 = vmatprep.mubr.msk.f32.mxu1 %vm783_vm1, %v7494_v24  ;;  %v7515_v10 = vld [vmem:[#allocation3 + $0x52] sm:$0xff] }
 0x14a   : > { %6376 = vmatprep.subr.bf16.mxu1 %v6375_v46  ;;  %6346 = vmatpush3.bf16.msra.mxu0 %v6343_v1  ;;  %v7540_v1 = vld [vmem:[#allocation3 + $0x82] sm:$0xff] }
 0x14b   : > { %5886 = vmatmul.mubr.msk.f32.gmra.mrb[36].mxu0 %vm783_vm1, %v7183_v12  ;;  %6348 = vmatprep.subr.bf16.mxu0 %v7498_v63  ;;  %v7522_v12 = vld [vmem:[#allocation3 + $0x62] sm:$0xff] }
 0x14c   : > { %6107 = vmatmul.mubr.msk.f32.gmra.mrb[2].mxu1 %vm783_vm1, %v7500_v25  ;;  %5888 = vmatprep.mubr.msk.f32.mxu0 %vm783_vm1, %v7193_v19  ;;  %v7528_v19 = vld [vmem:[#allocation3 + $0x6a] sm:$0xff] }
 0x14d   : > { %6109 = vmatprep.mubr.msk.f32.mxu1 %vm783_vm1, %v7508_v9  ;;  %6378 = vmatpush3.bf16.msra.mxu1 %v6375_v46  ;;  %v7546_v46 = vld [vmem:[#allocation3 + $0x92] sm:$0xff] }
 0x14e   : > { %6380 = vmatprep.subr.bf16.mxu1 %v7502_v23 }
 0x14f   : > { %5889 = vmatmul.mubr.msk.f32.gmra.mrb[38].mxu0 %vm783_vm1, %v7204_v22  ;;  %v7534_v22 = vld [vmem:[#allocation3 + $0x7a] sm:$0xff] }
 0x150   : > { %6110 = vmatmul.mubr.msk.f32.gmra.mrb[4].mxu1 %vm783_vm1, %v7515_v10  ;;  %5891 = vmatprep.mubr.msk.f32.mxu0 %vm783_vm1, %v7214_v29 }
 0x151   : > { %6112 = vmatprep.mubr.msk.f32.mxu1 %vm783_vm1, %v7522_v12 }
 0x153   : > { %5892 = vmatmul.mubr.msk.f32.gmra.mrb[40].mxu0 %vm783_vm1, %v7224_v33 }
 0x154   : > { %6113 = vmatmul.mubr.msk.f32.gmra.mrb[6].mxu1 %vm783_vm1, %v7528_v19  ;;  %5894 = vmatprep.mubr.msk.f32.mxu0 %vm783_vm1, %v7234_v41  ;;  %v5329_v41 = vld [vmem:[%s8163_s5 + $0xf8] sm:$0xff] }
 0x155   : > { %6115 = vmatprep.mubr.msk.f32.mxu1 %vm783_vm1, %v7534_v22 }
 0x157   : > { %5895 = vmatmul.mubr.msk.f32.gmra.mrb[42].mxu0 %vm783_vm1, %v7244_v44  ;;  %v5328_v44 = vld [vmem:[%s8163_s5 + $0xf0] sm:$0xff] }
 0x158   : > { %6116 = vmatmul.mubr.msk.f32.gmra.mrb[8].mxu1 %vm783_vm1, %v7540_v1  ;;  %5897 = vmatprep.mubr.msk.f32.mxu0 %vm783_vm1, %v7254_v51  ;;  %v1702_v51 = vld [vmem:[#allocation3 + $0xa] sm:$0xff] }
 0x159   : > { %6118 = vmatprep.mubr.msk.f32.mxu1 %vm783_vm1, %v7546_v46 }
 0x15b   : > { %5898 = vmatmul.mubr.msk.f32.gmra.mrb[44].mxu0 %vm783_vm1, %v7264_v54  ;;  %v5184_v54 = vld [vmem:[%s8163_s5 + $0x70] sm:$0xff] }
 0x15c   : > { %6119 = vmatmul.mubr.msk.f32.gmra.mrb[10].mxu1 %vm783_vm1, %v7552_v8  ;;  %5900 = vmatprep.mubr.msk.f32.mxu0 %vm783_vm1, %v7274_v62  ;;  %v7660_v62 = vld [vmem:[#allocation3 + $0x172] sm:$0xff] }
 0x15d   : > { %6121 = vmatprep.mubr.msk.f32.mxu1 %vm783_vm1, %v7558_v21  ;;  %8240 = vst [vmem:[#allocation39_spill] sm:$0xff] %v7660_v62 }
 0x15f   : > { %5901 = vmatmul.mubr.msk.f32.gmra.mrb[46].mxu0 %vm783_vm1, %v7284_v2  ;;  %v7582_v2 = vld [vmem:[#allocation3 + $0xda] sm:$0xff] }
 0x160   : > { %6122 = vmatmul.mubr.msk.f32.gmra.mrb[12].mxu1 %vm783_vm1, %v7564_v38  ;;  %5903 = vmatprep.mubr.msk.f32.mxu0 %vm783_vm1, %v7294_v14  ;;  %v7588_v14 = vld [vmem:[#allocation3 + $0xe2] sm:$0xff] }
 0x161   : > { %6124 = vmatprep.mubr.msk.f32.mxu1 %vm783_vm1, %v7570_v59 }
 0x163   : > { %5904 = vmatmul.mubr.msk.f32.gmra.mrb[48].mxu0 %vm783_vm1, %v7304_v17  ;;  %v7594_v17 = vld [vmem:[#allocation3 + $0xf2] sm:$0xff] }
 0x164   : > { %6125 = vmatmul.mubr.msk.f32.gmra.mrb[14].mxu1 %vm783_vm1, %v7576_v56  ;;  %5906 = vmatprep.mubr.msk.f32.mxu0 %vm783_vm1, %v7314_v32  ;;  %v7600_v32 = vld [vmem:[#allocation3 + $0xfa] sm:$0xff] }
 0x165   : > { %6127 = vmatprep.mubr.msk.f32.mxu1 %vm783_vm1, %v7582_v2 }
 0x167   : > { %5907 = vmatmul.mubr.msk.f32.gmra.mrb[50].mxu0 %vm783_vm1, %v7324_v36  ;;  %v7606_v36 = vld [vmem:[#allocation3 + $0x10a] sm:$0xff] }
 0x168   : > { %6128 = vmatmul.mubr.msk.f32.gmra.mrb[16].mxu1 %vm783_vm1, %v7588_v14  ;;  %5909 = vmatprep.mubr.msk.f32.mxu0 %vm783_vm1, %v7334_v48  ;;  %v7612_v48 = vld [vmem:[#allocation3 + $0x112] sm:$0xff] }
 0x169   : > { %6130 = vmatprep.mubr.msk.f32.mxu1 %vm783_vm1, %v7594_v17 }
 0x16b   : > { %5910 = vmatmul.mubr.msk.f32.gmra.mrb[52].mxu0 %vm783_vm1, %v7344_v55  ;;  %v7618_v55 = vld [vmem:[#allocation3 + $0x122] sm:$0xff] }
 0x16c   : > { %6131 = vmatmul.mubr.msk.f32.gmra.mrb[18].mxu1 %vm783_vm1, %v7600_v32  ;;  %5912 = vmatprep.mubr.msk.f32.mxu0 %vm783_vm1, %v7354_v6  ;;  %v7624_v6 = vld [vmem:[#allocation3 + $0x12a] sm:$0xff] }
 0x16d   : > { %6133 = vmatprep.mubr.msk.f32.mxu1 %vm783_vm1, %v7606_v36 }
 0x16f   : > { %5913 = vmatmul.mubr.msk.f32.gmra.mrb[54].mxu0 %vm783_vm1, %v7364_v11  ;;  %v7630_v11 = vld [vmem:[#allocation3 + $0x13a] sm:$0xff] }
 0x170   : > { %6134 = vmatmul.mubr.msk.f32.gmra.mrb[20].mxu1 %vm783_vm1, %v7612_v48  ;;  %5915 = vmatprep.mubr.msk.f32.mxu0 %vm783_vm1, %v7374_v35  ;;  %v7636_v35 = vld [vmem:[#allocation3 + $0x142] sm:$0xff] }
 0x171   : > { %6136 = vmatprep.mubr.msk.f32.mxu1 %vm783_vm1, %v7618_v55 }
 0x173   : > { %5916 = vmatmul.mubr.msk.f32.gmra.mrb[56].mxu0 %vm783_vm1, %v7384_v43  ;;  %v7642_v43 = vld [vmem:[#allocation3 + $0x152] sm:$0xff] }
 0x174   : > { %6137 = vmatmul.mubr.msk.f32.gmra.mrb[22].mxu1 %vm783_vm1, %v7624_v6  ;;  %5918 = vmatprep.mubr.msk.f32.mxu0 %vm783_vm1, %v7394_v60  ;;  %v7648_v60 = vld [vmem:[#allocation3 + $0x15a] sm:$0xff] }
 0x175   : > { %6139 = vmatprep.mubr.msk.f32.mxu1 %vm783_vm1, %v7630_v11 }
 0x177   : > { %5919 = vmatmul.mubr.msk.f32.gmra.mrb[58].mxu0 %vm783_vm1, %v7404_v16  ;;  %v7654_v16 = vld [vmem:[#allocation3 + $0x16a] sm:$0xff] }
 0x178   : > { %6140 = vmatmul.mubr.msk.f32.gmra.mrb[24].mxu1 %vm783_vm1, %v7636_v35  ;;  %5921 = vmatprep.mubr.msk.f32.mxu0 %vm783_vm1, %v7413_v31  ;;  %8239 = vst [vmem:[#allocation38_spill] sm:$0xff] %v7654_v16  ;;  %v1701_v31 = vld [vmem:[#allocation3 + $0x2] sm:$0xff] }
 0x179   : > { %6142 = vmatprep.mubr.msk.f32.mxu1 %vm783_vm1, %v7642_v43 }
 0x17b   : > { %5922 = vmatmul.mubr.msk.f32.gmra.mrb[60].mxu0 %vm783_vm1, %v7422_v39  ;;  %v7666_v39 = vld [vmem:[#allocation3 + $0x182] sm:$0xff] }
 0x17c   : > { %6143 = vmatmul.mubr.msk.f32.gmra.mrb[26].mxu1 %vm783_vm1, %v7648_v60  ;;  %5924 = vmatprep.mubr.msk.f32.mxu0 %vm783_vm1, %v7430_v53  ;;  %8241 = vst [vmem:[#allocation40_spill] sm:$0xff] %v7666_v39  ;;  %v5185_v53 = vld [vmem:[%s8163_s5 + $0x78] sm:$0xff] }
 0x17d   : > { %6145 = vmatprep.mubr.msk.f32.mxu1 %vm783_vm1, %v7654_v16  ;;  %v6351_v33 = vpack.c.bf16 %v5185_v53, %v5184_v54  ;;  %v5363_v54 = vld [vmem:[%s8163_s5 + $0x108] sm:$0xff]  ;;  %v3548_v53 = vld [vmem:[#allocation3 + $0x198] sm:$0xff] }
 0x17f   : > { %5925 = vmatmul.mubr.msk.f32.gmra.mrb[62].mxu0 %vm783_vm1, %v7438_v57  ;;  %v7677_v57 = vld [vmem:[#allocation3 + $0x18a] sm:$0xff] }
 0x180   : > { %6146 = vmatmul.mubr.msk.f32.gmra.mrb[28].mxu1 %vm783_vm1, %v7660_v62  ;;  %5935 = vmatprep.mubr.msk.f32.mxu0 %vm783_vm1, %v1701_v31  ;;  %8242 = vst [vmem:[#allocation41_spill] sm:$0xff] %v7677_v57  ;;  %v6383_v31 = vpack.c.bf16 %v5329_v41, %v5328_v44  ;;  %v8247_v41 = vld [vmem:[#allocation32_spill] sm:$0xff]  ;;  %v8248_v44 = vld [vmem:[#allocation34_spill] sm:$0xff] }
 0x181   : > { %6148 = vmatprep.mubr.msk.f32.mxu1 %vm783_vm1, %v7666_v39  ;;  %v3972_v39 = vld [vmem:[#allocation3 + $0x31] sm:$0xff] }
 0x183   : > { %5936 = vmatmul.mubr.msk.f32.vlgmr.msra.gmra.mrb[32].mxu0 %vm783_vm1, %v1702_v51  ;;  %v5362_v51 = vld [vmem:[%s8163_s5 + $0x100] sm:$0xff] }
 0x184   : > { %6149 = vmatmul.mubr.msk.f32.gmra.mrb[30].mxu1 %vm783_vm1, %v7677_v57  ;;  %5938 = vmatprep.mubr.msk.f32.mxu0 %vm783_vm1, %v7466_v45  ;;  %v7817_v45 = vld [vmem:[#allocation3 + $0x188] sm:$0xff]  ;;  %v2157_v57 = vld [vmem:[#allocation3 + $0x30] sm:$0xff] }
 0x185   : > { %6159 = vmatprep.mubr.msk.f32.mxu1 %vm783_vm1, %v7169_v3  ;;  %6350 = vmatpush3.bf16.msra.mxu0 %v7498_v63  ;;  %v7708_v3 = vpack.c.bf16 %v5363_v54, %v5362_v51  ;;  %v2155_v63 = vld [vmem:[#allocation3 + $0x18] sm:$0xff]  ;;  %v5364_v51 = vld [vmem:[%s8163_s5 + $0x110] sm:$0xff] }
 0x186   : > { %6352 = vmatprep.subr.bf16.mxu0 %v6351_v33  ;;  %v5365_v54 = vld [vmem:[%s8163_s5 + $0x118] sm:$0xff] }
 0x187   : > { %5939 = vmatmul.mubr.msk.f32.gmra.mrb[34].mxu0 %vm783_vm1, %v7473_v58  ;;  %v7811_v58 = vld [vmem:[#allocation3 + $0x180] sm:$0xff] }
 0x188   : > { %6160 = vmatmul.mubr.msk.f32.vlgmr.msra.gmra.mrb[0].mxu1 %vm783_vm1, %v7173_v4  ;;  %5941 = vmatprep.mubr.msk.f32.mxu0 %vm783_vm1, %v7494_v24  ;;  %v8243_v4 = vld [vmem:[#allocation24_spill] sm:$0xff] }
 0x189   : > { %6382 = vmatpush3.bf16.msra.mxu1 %v7502_v23  ;;  %6162 = vmatprep.mubr.msk.f32.mxu1 %vm783_vm1, %v7191_v18  ;;  %v8244_v18 = vld [vmem:[#allocation26_spill] sm:$0xff]  ;;  %v3549_v23 = vld [vmem:[#allocation3 + $0x1a0] sm:$0xff] }
 0x18a   : > { %6384 = vmatprep.subr.bf16.mxu1 %v6383_v31  ;;  %6354 = vmatpush3.bf16.msra.mxu0 %v6351_v33  ;;  %v8246_v33 = vld [vmem:[#allocation30_spill] sm:$0xff] }
 0x18b   : > { %5942 = vmatmul.mubr.msk.f32.gmra.mrb[36].mxu0 %vm783_vm1, %v7500_v25 }
 0x18c   : > { %6163 = vmatmul.mubr.msk.f32.gmra.mrb[2].mxu1 %vm783_vm1, %v7195_v20  ;;  %5944 = vmatprep.mubr.msk.f32.mxu0 %vm783_vm1, %v7508_v9  ;;  %v8245_v20 = vld [vmem:[#allocation28_spill] sm:$0xff] }
 0x18d   : > { %6165 = vmatprep.mubr.msk.f32.mxu1 %vm783_vm1, %v7212_v28  ;;  %6386 = vmatpush3.bf16.msra.mxu1 %v6383_v31  ;;  %v2156_v31 = vld [vmem:[#allocation3 + $0x20] sm:$0xff] }
 0x18e   : > { %6388 = vmatprep.subr.bf16.mxu1 %v7708_v3 }
 0x18f   : > { %5945 = vmatmul.mubr.msk.f32.gmra.mrb[38].mxu0 %vm783_vm1, %v7515_v10 }
 0x190   : > { %6166 = vmatmul.mubr.msk.f32.gmra.mrb[4].mxu1 %vm783_vm1, %v7216_v30  ;;  %5947 = vmatprep.mubr.msk.f32.mxu0 %vm783_vm1, %v7522_v12 }
 0x191   : > { %6168 = vmatprep.mubr.msk.f32.mxu1 %vm783_vm1, %v7232_v40 }
 0x193   : > { %5948 = vmatmul.mubr.msk.f32.gmra.mrb[40].mxu0 %vm783_vm1, %v7528_v19 }
 0x194   : > { %6169 = vmatmul.mubr.msk.f32.gmra.mrb[6].mxu1 %vm783_vm1, %v7236_v42  ;;  %5950 = vmatprep.mubr.msk.f32.mxu0 %vm783_vm1, %v7534_v22 }
 0x195   : > { %6171 = vmatprep.mubr.msk.f32.mxu1 %vm783_vm1, %v7252_v50 }
 0x197   : > { %5951 = vmatmul.mubr.msk.f32.gmra.mrb[42].mxu0 %vm783_vm1, %v7540_v1 }
 0x198   : > { %6172 = vmatmul.mubr.msk.f32.gmra.mrb[8].mxu1 %vm783_vm1, %v7256_v52  ;;  %5953 = vmatprep.mubr.msk.f32.mxu0 %vm783_vm1, %v7546_v46 }
 0x199   : > { %6174 = vmatprep.mubr.msk.f32.mxu1 %vm783_vm1, %v7272_v61 }
 0x19b   : > { %5954 = vmatmul.mubr.msk.f32.gmra.mrb[44].mxu0 %vm783_vm1, %v7552_v8 }
 0x19c   : > { %6175 = vmatmul.mubr.msk.f32.gmra.mrb[10].mxu1 %vm783_vm1, %v7276_v0  ;;  %5956 = vmatprep.mubr.msk.f32.mxu0 %vm783_vm1, %v7558_v21 }
 0x19d   : > { %6177 = vmatprep.mubr.msk.f32.mxu1 %vm783_vm1, %v7292_v13 }
 0x19f   : > { %5957 = vmatmul.mubr.msk.f32.gmra.mrb[46].mxu0 %vm783_vm1, %v7564_v38 }
 0x1a0   : > { %6178 = vmatmul.mubr.msk.f32.gmra.mrb[12].mxu1 %vm783_vm1, %v7296_v15  ;;  %5959 = vmatprep.mubr.msk.f32.mxu0 %vm783_vm1, %v7570_v59 }
 0x1a1   : > { %6180 = vmatprep.mubr.msk.f32.mxu1 %vm783_vm1, %v7312_v27 }
 0x1a3   : > { %5960 = vmatmul.mubr.msk.f32.gmra.mrb[48].mxu0 %vm783_vm1, %v7576_v56 }
 0x1a4   : > { %6181 = vmatmul.mubr.msk.f32.gmra.mrb[14].mxu1 %vm783_vm1, %v7316_v34  ;;  %5962 = vmatprep.mubr.msk.f32.mxu0 %vm783_vm1, %v7582_v2 }
 0x1a5   : > { %6183 = vmatprep.mubr.msk.f32.mxu1 %vm783_vm1, %v7332_v47 }
 0x1a7   : > { %5963 = vmatmul.mubr.msk.f32.gmra.mrb[50].mxu0 %vm783_vm1, %v7588_v14 }
 0x1a8   : > { %6184 = vmatmul.mubr.msk.f32.gmra.mrb[16].mxu1 %vm783_vm1, %v7336_v49  ;;  %5965 = vmatprep.mubr.msk.f32.mxu0 %vm783_vm1, %v7594_v17 }
 0x1a9   : > { %6186 = vmatprep.mubr.msk.f32.mxu1 %vm783_vm1, %v7352_v5 }
 0x1ab   : > { %5966 = vmatmul.mubr.msk.f32.gmra.mrb[52].mxu0 %vm783_vm1, %v7600_v32 }
 0x1ac   : > { %6187 = vmatmul.mubr.msk.f32.gmra.mrb[18].mxu1 %vm783_vm1, %v7356_v7  ;;  %5968 = vmatprep.mubr.msk.f32.mxu0 %vm783_vm1, %v7606_v36 }
 0x1ad   : > { %6189 = vmatprep.mubr.msk.f32.mxu1 %vm783_vm1, %v7372_v26 }
 0x1af   : > { %5969 = vmatmul.mubr.msk.f32.gmra.mrb[54].mxu0 %vm783_vm1, %v7612_v48 }
 0x1b0   : > { %6190 = vmatmul.mubr.msk.f32.gmra.mrb[20].mxu1 %vm783_vm1, %v7376_v37  ;;  %5971 = vmatprep.mubr.msk.f32.mxu0 %vm783_vm1, %v7618_v55 }
 0x1b1   : > { %6192 = vmatprep.mubr.msk.f32.mxu1 %vm783_vm1, %v8243_v4 }
 0x1b3   : > { %5972 = vmatmul.mubr.msk.f32.gmra.mrb[56].mxu0 %vm783_vm1, %v7624_v6 }
 0x1b4   : > { %6193 = vmatmul.mubr.msk.f32.gmra.mrb[22].mxu1 %vm783_vm1, %v8244_v18  ;;  %5974 = vmatprep.mubr.msk.f32.mxu0 %vm783_vm1, %v7630_v11 }
 0x1b5   : > { %6195 = vmatprep.mubr.msk.f32.mxu1 %vm783_vm1, %v8245_v20 }
 0x1b7   : > { %5975 = vmatmul.mubr.msk.f32.gmra.mrb[58].mxu0 %vm783_vm1, %v7636_v35 }
 0x1b8   : > { %6196 = vmatmul.mubr.msk.f32.gmra.mrb[24].mxu1 %vm783_vm1, %v8246_v33  ;;  %5977 = vmatprep.mubr.msk.f32.mxu0 %vm783_vm1, %v7642_v43 }
 0x1b9   : > { %6198 = vmatprep.mubr.msk.f32.mxu1 %vm783_vm1, %v8247_v41 }
 0x1bb   : > { %5978 = vmatmul.mubr.msk.f32.gmra.mrb[60].mxu0 %vm783_vm1, %v7648_v60 }
 0x1bc   : > { %6199 = vmatmul.mubr.msk.f32.gmra.mrb[26].mxu1 %vm783_vm1, %v8248_v44  ;;  %5980 = vmatprep.mubr.msk.f32.mxu0 %vm783_vm1, %v7654_v16  ;;  %v2159_v16 = vld [vmem:[#allocation3 + $0x48] sm:$0xff] }
 0x1bd   : > { %6201 = vmatprep.mubr.msk.f32.mxu1 %vm783_vm1, %v7811_v58 }
 0x1bf   : > { %5981 = vmatmul.mubr.msk.f32.gmra.mrb[62].mxu0 %vm783_vm1, %v7660_v62  ;;  %v3973_v62 = vld [vmem:[#allocation3 + $0x39] sm:$0xff] }
 0x1c0   : > { %6202 = vmatmul.mubr.msk.f32.gmra.mrb[28].mxu1 %vm783_vm1, %v7817_v45  ;;  %5991 = vmatprep.mubr.msk.f32.mxu0 %vm783_vm1, %v2155_v63  ;;  %v2158_v63 = vld [vmem:[#allocation3 + $0x38] sm:$0xff] }
 0x1c1   : > { %6204 = vmatprep.mubr.msk.f32.mxu1 %vm783_vm1, %v3548_v53  ;;  %v6391_v53 = vpack.c.bf16 %v5365_v54, %v5364_v51 }
 0x1c3   : > { %5992 = vmatmul.mubr.msk.f32.vlgmr.msra.gmra.mrb[32].mxu0 %vm783_vm1, %v2156_v31  ;;  %v3974_v31 = vld [vmem:[#allocation3 + $0x49] sm:$0xff] }
 0x1c4   : > { %6205 = vmatmul.mubr.msk.f32.gmra.mrb[30].mxu1 %vm783_vm1, %v3549_v23  ;;  %5994 = vmatprep.mubr.msk.f32.mxu0 %vm783_vm1, %v2157_v57  ;;  %v2160_v23 = vld [vmem:[#allocation3 + $0x50] sm:$0xff] }
 0x1c5   : > { %6215 = vmatprep.mubr.msk.f32.mxu1 %vm783_vm1, %v3972_v39  ;;  %v3975_v57 = vld [vmem:[#allocation3 + $0x51] sm:$0xff]  ;;  %v8270_v39 = vld [vmem:[#allocation33_spill] sm:$0xff] }
 0x1c7   : > { %5995 = vmatmul.mubr.msk.f32.gmra.mrb[34].mxu0 %vm783_vm1, %v2158_v63 }
 0x1c8   : > { %6216 = vmatmul.mubr.msk.f32.vlgmr.msra.gmra.mrb[0].mxu1 %vm783_vm1, %v3973_v62  ;;  %5997 = vmatprep.mubr.msk.f32.mxu0 %vm783_vm1, %v2159_v16  ;;  %v8249_v62 = vld [vmem:[#allocation7_spill] sm:$0xff]  ;;  %v8250_v16 = vld [vmem:[#allocation8_spill] sm:$0xff] }
 0x1c9   : > { %6390 = vmatpush3.bf16.msra.mxu1 %v7708_v3  ;;  %6218 = vmatprep.mubr.msk.f32.mxu1 %vm783_vm1, %v3974_v31  ;;  %v8271_v3 = vld [vmem:[#allocation35_spill] sm:$0xff] }
 0x1ca   : > { %6392 = vmatprep.subr.bf16.mxu1 %v6391_v53 }
 0x1cb   : > { %5998 = vmatmul.mubr.msk.f32.gmra.mrb[36].mxu0 %vm783_vm1, %v2160_v23 }
 0x1cc   : > { %6219 = vmatmul.mubr.msk.f32.gmra.mrb[2].mxu1 %vm783_vm1, %v3975_v57  ;;  %6000 = vmatprep.mubr.msk.f32.mxu0 %vm783_vm1, %v7212_v28  ;;  %v8251_v28 = vld [vmem:[#allocation9_spill] sm:$0xff] }
 0x1cd   : > { %6221 = vmatprep.mubr.msk.f32.mxu1 %vm783_vm1, %v7214_v29  ;;  %6394 = vmatpush3.bf16.msra.mxu1 %v6391_v53  ;;  %v8252_v29 = vld [vmem:[#allocation10_spill] sm:$0xff] }
 0x1cf   : > { %6001 = vmatmul.mubr.msk.f32.gmra.mrb[38].mxu0 %vm783_vm1, %v7216_v30  ;;  %v8253_v30 = vld [vmem:[#allocation11_spill] sm:$0xff] }
 0x1d0   : > { %6222 = vmatmul.mubr.msk.f32.gmra.mrb[4].mxu1 %vm783_vm1, %v8249_v62  ;;  %6003 = vmatprep.mubr.msk.f32.mxu0 %vm783_vm1, %v7232_v40  ;;  %v8254_v40 = vld [vmem:[#allocation12_spill] sm:$0xff] }
 0x1d1   : > { %6224 = vmatprep.mubr.msk.f32.mxu1 %vm783_vm1, %v8250_v16 }
 0x1d3   : > { %6004 = vmatmul.mubr.msk.f32.gmra.mrb[40].mxu0 %vm783_vm1, %v7236_v42  ;;  %v8255_v42 = vld [vmem:[#allocation13_spill] sm:$0xff] }
 0x1d4   : > { %6225 = vmatmul.mubr.msk.f32.gmra.mrb[6].mxu1 %vm783_vm1, %v8251_v28  ;;  %6006 = vmatprep.mubr.msk.f32.mxu0 %vm783_vm1, %v7252_v50  ;;  %v8256_v50 = vld [vmem:[#allocation14_spill] sm:$0xff] }
 0x1d5   : > { %6227 = vmatprep.mubr.msk.f32.mxu1 %vm783_vm1, %v8252_v29 }
 0x1d7   : > { %6007 = vmatmul.mubr.msk.f32.gmra.mrb[42].mxu0 %vm783_vm1, %v7256_v52  ;;  %v8257_v52 = vld [vmem:[#allocation15_spill] sm:$0xff] }
 0x1d8   : > { %6228 = vmatmul.mubr.msk.f32.gmra.mrb[8].mxu1 %vm783_vm1, %v8253_v30  ;;  %6009 = vmatprep.mubr.msk.f32.mxu0 %vm783_vm1, %v7272_v61  ;;  %v8258_v61 = vld [vmem:[#allocation16_spill] sm:$0xff] }
 0x1d9   : > { %6230 = vmatprep.mubr.msk.f32.mxu1 %vm783_vm1, %v8254_v40 }
 0x1db   : > { %6010 = vmatmul.mubr.msk.f32.gmra.mrb[44].mxu0 %vm783_vm1, %v7276_v0  ;;  %v8259_v0 = vld [vmem:[#allocation17_spill] sm:$0xff] }
 0x1dc   : > { %6231 = vmatmul.mubr.msk.f32.gmra.mrb[10].mxu1 %vm783_vm1, %v8255_v42  ;;  %6012 = vmatprep.mubr.msk.f32.mxu0 %vm783_vm1, %v7292_v13  ;;  %v8260_v13 = vld [vmem:[#allocation18_spill] sm:$0xff] }
 0x1dd   : > { %6233 = vmatprep.mubr.msk.f32.mxu1 %vm783_vm1, %v8256_v50 }
 0x1df   : > { %6013 = vmatmul.mubr.msk.f32.gmra.mrb[46].mxu0 %vm783_vm1, %v7296_v15  ;;  %v8261_v15 = vld [vmem:[#allocation19_spill] sm:$0xff] }
 0x1e0   : > { %6234 = vmatmul.mubr.msk.f32.gmra.mrb[12].mxu1 %vm783_vm1, %v8257_v52  ;;  %6015 = vmatprep.mubr.msk.f32.mxu0 %vm783_vm1, %v7312_v27  ;;  %v8262_v27 = vld [vmem:[#allocation20_spill] sm:$0xff] }
 0x1e1   : > { %6236 = vmatprep.mubr.msk.f32.mxu1 %vm783_vm1, %v8258_v61 }
 0x1e3   : > { %6016 = vmatmul.mubr.msk.f32.gmra.mrb[48].mxu0 %vm783_vm1, %v7316_v34  ;;  %v8263_v34 = vld [vmem:[#allocation21_spill] sm:$0xff] }
 0x1e4   : > { %6237 = vmatmul.mubr.msk.f32.gmra.mrb[14].mxu1 %vm783_vm1, %v8259_v0  ;;  %6018 = vmatprep.mubr.msk.f32.mxu0 %vm783_vm1, %v7332_v47  ;;  %v8264_v47 = vld [vmem:[#allocation22_spill] sm:$0xff] }
 0x1e5   : > { %6239 = vmatprep.mubr.msk.f32.mxu1 %vm783_vm1, %v8260_v13 }
 0x1e7   : > { %6019 = vmatmul.mubr.msk.f32.gmra.mrb[50].mxu0 %vm783_vm1, %v7336_v49  ;;  %v8265_v49 = vld [vmem:[#allocation23_spill] sm:$0xff] }
 0x1e8   : > { %6240 = vmatmul.mubr.msk.f32.gmra.mrb[16].mxu1 %vm783_vm1, %v8261_v15  ;;  %6021 = vmatprep.mubr.msk.f32.mxu0 %vm783_vm1, %v7352_v5  ;;  %v8266_v5 = vld [vmem:[#allocation25_spill] sm:$0xff] }
 0x1e9   : > { %6242 = vmatprep.mubr.msk.f32.mxu1 %vm783_vm1, %v8262_v27 }
 0x1eb   : > { %6022 = vmatmul.mubr.msk.f32.gmra.mrb[52].mxu0 %vm783_vm1, %v7356_v7  ;;  %v8267_v7 = vld [vmem:[#allocation27_spill] sm:$0xff] }
 0x1ec   : > { %6243 = vmatmul.mubr.msk.f32.gmra.mrb[18].mxu1 %vm783_vm1, %v8263_v34  ;;  %6024 = vmatprep.mubr.msk.f32.mxu0 %vm783_vm1, %v7372_v26  ;;  %v8268_v26 = vld [vmem:[#allocation29_spill] sm:$0xff] }
 0x1ed   : > { %6245 = vmatprep.mubr.msk.f32.mxu1 %vm783_vm1, %v8264_v47 }
 0x1ef   : > { %6025 = vmatmul.mubr.msk.f32.gmra.mrb[54].mxu0 %vm783_vm1, %v7376_v37  ;;  %v8269_v37 = vld [vmem:[#allocation31_spill] sm:$0xff] }
 0x1f0   : > { %6246 = vmatmul.mubr.msk.f32.gmra.mrb[20].mxu1 %vm783_vm1, %v8265_v49  ;;  %6027 = vmatprep.mubr.msk.f32.mxu0 %vm783_vm1, %v8243_v4  ;;  %v8272_v4 = vld [vmem:[#allocation36_spill] sm:$0xff] }
 0x1f1   : > { %6248 = vmatprep.mubr.msk.f32.mxu1 %vm783_vm1, %v8266_v5 }
 0x1f3   : > { %6028 = vmatmul.mubr.msk.f32.gmra.mrb[56].mxu0 %vm783_vm1, %v8244_v18  ;;  %v4002_v18 = vld [vmem:[#allocation3 + $0x199] sm:$0xff] }
 0x1f4   : > { %6249 = vmatmul.mubr.msk.f32.gmra.mrb[22].mxu1 %vm783_vm1, %v8267_v7  ;;  %6030 = vmatprep.mubr.msk.f32.mxu0 %vm783_vm1, %v8245_v20  ;;  %v8273_v20 = vld [vmem:[#allocation37_spill] sm:$0xff] }
 0x1f5   : > { %6251 = vmatprep.mubr.msk.f32.mxu1 %vm783_vm1, %v8268_v26 }
 0x1f7   : > { %6031 = vmatmul.mubr.msk.f32.gmra.mrb[58].mxu0 %vm783_vm1, %v8246_v33  ;;  %v4003_v33 = vld [vmem:[#allocation3 + $0x1a1] sm:$0xff] }
 0x1f8   : > { %6252 = vmatmul.mubr.msk.f32.gmra.mrb[24].mxu1 %vm783_vm1, %v8269_v37  ;;  %6033 = vmatprep.mubr.msk.f32.mxu0 %vm783_vm1, %v8247_v41 }
 0x1f9   : > { %6254 = vmatprep.mubr.msk.f32.mxu1 %vm783_vm1, %v8270_v39 }
 0x1fb   : > { %6034 = vmatmul.mubr.msk.f32.gmra.mrb[60].mxu0 %vm783_vm1, %v8248_v44 }
 0x1fc   : > { %6255 = vmatmul.mubr.msk.f32.gmra.mrb[26].mxu1 %vm783_vm1, %v8271_v3  ;;  %6036 = vmatprep.mubr.msk.f32.mxu0 %vm783_vm1, %v7811_v58 }
 0x1fd   : > { %6257 = vmatprep.mubr.msk.f32.mxu1 %vm783_vm1, %v8272_v4 }
 0x1ff   : > { %6037 = vmatmul.mubr.msk.f32.gmra.mrb[62].mxu0 %vm783_vm1, %v7817_v45 }
 0x200   : > { %6258 = vmatmul.mubr.msk.f32.gmra.mrb[28].mxu1 %vm783_vm1, %v8273_v20 }
 0x201   : > { %6260 = vmatprep.mubr.msk.f32.mxu1 %vm783_vm1, %v4002_v18 }
 0x204   : > { %6261 = vmatmul.mubr.msk.f32.gmra.mrb[30].mxu1 %vm783_vm1, %v4003_v33 }
 0x205   : > { %6271 = vmatprep.mubr.msk.f32.mxu1 %vm783_vm1, %v7494_v24 }
 0x208   : > { %6272 = vmatmul.mubr.msk.f32.vlgmr.msra.gmra.mrb[0].mxu1 %vm783_vm1, %v7500_v25 }
 0x209   : > { %6274 = vmatprep.mubr.msk.f32.mxu1 %vm783_vm1, %v7508_v9 }
 0x20c   : > { %6275 = vmatmul.mubr.msk.f32.gmra.mrb[2].mxu1 %vm783_vm1, %v7515_v10 }
 0x20d   : > { %6277 = vmatprep.mubr.msk.f32.mxu1 %vm783_vm1, %v7522_v12 }
 0x210   : > { %6278 = vmatmul.mubr.msk.f32.gmra.mrb[4].mxu1 %vm783_vm1, %v7528_v19 }
 0x211   : > { %6280 = vmatprep.mubr.msk.f32.mxu1 %vm783_vm1, %v7534_v22 }
 0x214   : > { %6281 = vmatmul.mubr.msk.f32.gmra.mrb[6].mxu1 %vm783_vm1, %v7540_v1 }
 0x215   : > { %6283 = vmatprep.mubr.msk.f32.mxu1 %vm783_vm1, %v7546_v46 }
 0x218   : > { %6284 = vmatmul.mubr.msk.f32.gmra.mrb[8].mxu1 %vm783_vm1, %v7552_v8 }
 0x219   : > { %6286 = vmatprep.mubr.msk.f32.mxu1 %vm783_vm1, %v7558_v21 }
 0x21c   : > { %6287 = vmatmul.mubr.msk.f32.gmra.mrb[10].mxu1 %vm783_vm1, %v7564_v38 }
 0x21d   : > { %6289 = vmatprep.mubr.msk.f32.mxu1 %vm783_vm1, %v7570_v59 }
 0x220   : > { %6290 = vmatmul.mubr.msk.f32.gmra.mrb[12].mxu1 %vm783_vm1, %v7576_v56 }
 0x221   : > { %6292 = vmatprep.mubr.msk.f32.mxu1 %vm783_vm1, %v7582_v2  ;;  %v8274_v2 = vld [vmem:[#allocation38_spill] sm:$0xff] }
 0x224   : > { %6293 = vmatmul.mubr.msk.f32.gmra.mrb[14].mxu1 %vm783_vm1, %v7588_v14  ;;  %v8275_v14 = vld [vmem:[#allocation39_spill] sm:$0xff] }
 0x225   : > { %6295 = vmatprep.mubr.msk.f32.mxu1 %vm783_vm1, %v7594_v17  ;;  %v8276_v17 = vld [vmem:[#allocation40_spill] sm:$0xff] }
 0x228   : > { %6296 = vmatmul.mubr.msk.f32.gmra.mrb[16].mxu1 %vm783_vm1, %v7600_v32  ;;  %v4456_v32 = vld [vmem:[#allocation3 + $0x19a] sm:$0xff] }
 0x229   : > { %6298 = vmatprep.mubr.msk.f32.mxu1 %vm783_vm1, %v7606_v36  ;;  %v8277_v36 = vld [vmem:[#allocation41_spill] sm:$0xff] }
 0x22c   : > { %6299 = vmatmul.mubr.msk.f32.gmra.mrb[18].mxu1 %vm783_vm1, %v7612_v48  ;;  %v4457_v48 = vld [vmem:[#allocation3 + $0x1a2] sm:$0xff] }
 0x22d   : > { %6301 = vmatprep.mubr.msk.f32.mxu1 %vm783_vm1, %v7618_v55 }
 0x230   : > { %6302 = vmatmul.mubr.msk.f32.gmra.mrb[20].mxu1 %vm783_vm1, %v7624_v6 }
 0x231   : > { %6304 = vmatprep.mubr.msk.f32.mxu1 %vm783_vm1, %v7630_v11 }
 0x234   : > { %6305 = vmatmul.mubr.msk.f32.gmra.mrb[22].mxu1 %vm783_vm1, %v7636_v35 }
 0x235   : > { %6307 = vmatprep.mubr.msk.f32.mxu1 %vm783_vm1, %v7642_v43 }
 0x238   : > { %6308 = vmatmul.mubr.msk.f32.gmra.mrb[24].mxu1 %vm783_vm1, %v7648_v60 }
 0x239   : > { %6310 = vmatprep.mubr.msk.f32.mxu1 %vm783_vm1, %v8274_v2 }
 0x23c   : > { %6311 = vmatmul.mubr.msk.f32.gmra.mrb[26].mxu1 %vm783_vm1, %v8275_v14 }
 0x23d   : > { %6313 = vmatprep.mubr.msk.f32.mxu1 %vm783_vm1, %v8276_v17 }
 0x240   : > { %6314 = vmatmul.mubr.msk.f32.gmra.mrb[28].mxu1 %vm783_vm1, %v8277_v36 }
 0x241   : > { %6316 = vmatprep.mubr.msk.f32.mxu1 %vm783_vm1, %v4456_v32 }
 0x244   : > { %6317 = vmatmul.mubr.msk.f32.gmra.mrb[30].mxu1 %vm783_vm1, %v4457_v48 }
 0x296   : > { %v5993_v55 = vpop.f32.mrb[32].mxu0 }
 0x297   : > { %v2354_v6 = vpop.f32.mrb[33].mxu0 }
 0x29a   : > { %v5996_v11 = vpop.f32.mrb[34].mxu0 }
 0x29b   : > { %v2364_v35 = vpop.f32.mrb[35].mxu0 }
 0x29e   : > { %v5999_v43 = vpop.f32.mrb[36].mxu0 }
 0x29f   : > { %v2374_v60 = vpop.f32.mrb[37].mxu0 }
 0x2a2   : > { %v6002_v56 = vpop.f32.mrb[38].mxu0 }
 0x2a3   : > { %v2384_v24 = vpop.f32.mrb[39].mxu0 }
 0x2a6   : > { %v6005_v25 = vpop.f32.mrb[40].mxu0 }
 0x2a7   : > { %v2394_v9 = vpop.f32.mrb[41].mxu0 }
 0x2aa   : > { %v6008_v10 = vpop.f32.mrb[42].mxu0 }
 0x2ab   : > { %v2404_v12 = vpop.f32.mrb[43].mxu0 }
 0x2ae   : > { %v6011_v19 = vpop.f32.mrb[44].mxu0 }
 0x2af   : > { %v2414_v22 = vpop.f32.mrb[45].mxu0 }
 0x2b2   : > { %v8010_v1 = vpop.f32.mrb[46].mxu0 }
 0x2b3   : > { %v8012_v46 = vpop.f32.mrb[47].mxu0 }
 0x2b6   : > { %v8014_v8 = vpop.f32.mrb[48].mxu0 }
 0x2b7   : > { %v8016_v21 = vpop.f32.mrb[49].mxu0 }
 0x2ba   : > { %v8018_v38 = vpop.f32.mrb[50].mxu0 }
 0x2bb   : > { %v8020_v59 = vpop.f32.mrb[51].mxu0 }
 0x2be   : > { %v8022_v41 = vpop.f32.mrb[52].mxu0 }
 0x2bf   : > { %v8024_v44 = vpop.f32.mrb[53].mxu0 }
 0x2c2   : > { %v8026_v58 = vpop.f32.mrb[54].mxu0 }
 0x2c3   : > { %v8028_v45 = vpop.f32.mrb[55].mxu0 }
 0x2c6   : > { %v8030_v51 = vpop.f32.mrb[56].mxu0 }
 0x2c7   : > { %v8032_v54 = vpop.f32.mrb[57].mxu0 }
 0x2ca   : > { %v8034_v53 = vpop.f32.mrb[58].mxu0 }
 0x2cb   : > { %v8036_v63 = vpop.f32.mrb[59].mxu0 }
 0x2ce   : > { %v8038_v31 = vpop.f32.mrb[60].mxu0 }
 0x2cf   : > { %v8040_v23 = vpop.f32.mrb[61].mxu0 }
 0x2d2   : > { %v8042_v57 = vpop.f32.mrb[62].mxu0 }
 0x2d3   : > { %v8044_v62 = vpop.f32.mrb[63].mxu0 }
 0x2db   : > { %v6273_v16 = vpop.f32.mrb[0].mxu1 }
 0x2dc   : > { %v6395_v28 = vadd.f32 %v6273_v16, %v5993_v55  ;;  %v4625_v29 = vpop.f32.mrb[1].mxu1 }
 0x2dd   : > { %v6396_v30 = vadd.f32 %v4625_v29, %v2354_v6 }
 0x2de   : > { %4913 = vst [vmem:[%s8049_s16 + $0x8] sm:$0xff] %v6395_v28 }
 0x2df   : > { %4912 = vst [vmem:[%s8049_s16] sm:$0xff] %v6396_v30  ;;  %v6276_v40 = vpop.f32.mrb[2].mxu1 }
 0x2e0   : > { %v6397_v42 = vadd.f32 %v6276_v40, %v5996_v11  ;;  %v4635_v50 = vpop.f32.mrb[3].mxu1 }
 0x2e1   : > { %v6398_v52 = vadd.f32 %v4635_v50, %v2364_v35 }
 0x2e2   : > { %4915 = vst [vmem:[%s8049_s16 + $0x18] sm:$0xff] %v6397_v42 }
 0x2e3   : > { %4914 = vst [vmem:[%s8049_s16 + $0x10] sm:$0xff] %v6398_v52  ;;  %v6279_v61 = vpop.f32.mrb[4].mxu1 }
 0x2e4   : > { %v6399_v0 = vadd.f32 %v6279_v61, %v5999_v43  ;;  %v4645_v13 = vpop.f32.mrb[5].mxu1 }
 0x2e5   : > { %v6400_v15 = vadd.f32 %v4645_v13, %v2374_v60 }
 0x2e6   : > { %4917 = vst [vmem:[%s8049_s16 + $0x28] sm:$0xff] %v6399_v0 }
 0x2e7   : > { %4916 = vst [vmem:[%s8049_s16 + $0x20] sm:$0xff] %v6400_v15  ;;  %v6282_v27 = vpop.f32.mrb[6].mxu1 }
 0x2e8   : > { %v6401_v34 = vadd.f32 %v6282_v27, %v6002_v56  ;;  %v4655_v47 = vpop.f32.mrb[7].mxu1 }
 0x2e9   : > { %v6402_v49 = vadd.f32 %v4655_v47, %v2384_v24 }
 0x2ea   : > { %4919 = vst [vmem:[%s8049_s16 + $0x38] sm:$0xff] %v6401_v34 }
 0x2eb   : > { %4918 = vst [vmem:[%s8049_s16 + $0x30] sm:$0xff] %v6402_v49  ;;  %v6285_v5 = vpop.f32.mrb[8].mxu1 }
 0x2ec   : > { %v6403_v7 = vadd.f32 %v6285_v5, %v6005_v25  ;;  %v4665_v26 = vpop.f32.mrb[9].mxu1 }
 0x2ed   : > { %v6404_v37 = vadd.f32 %v4665_v26, %v2394_v9 }
 0x2ee   : > { %4921 = vst [vmem:[%s8049_s16 + $0x48] sm:$0xff] %v6403_v7 }
 0x2ef   : > { %4920 = vst [vmem:[%s8049_s16 + $0x40] sm:$0xff] %v6404_v37  ;;  %v6288_v39 = vpop.f32.mrb[10].mxu1 }
 0x2f0   : > { %v6405_v3 = vadd.f32 %v6288_v39, %v6008_v10  ;;  %v4675_v4 = vpop.f32.mrb[11].mxu1 }
 0x2f1   : > { %v6406_v18 = vadd.f32 %v4675_v4, %v2404_v12 }
 0x2f2   : > { %4923 = vst [vmem:[%s8049_s16 + $0x58] sm:$0xff] %v6405_v3 }
 0x2f3   : > { %4922 = vst [vmem:[%s8049_s16 + $0x50] sm:$0xff] %v6406_v18  ;;  %v6291_v20 = vpop.f32.mrb[12].mxu1 }
 0x2f4   : > { %v6407_v33 = vadd.f32 %v6291_v20, %v6011_v19  ;;  %v4685_v2 = vpop.f32.mrb[13].mxu1 }
 0x2f5   : > { %v6408_v14 = vadd.f32 %v4685_v2, %v2414_v22 }
 0x2f6   : > { %4925 = vst [vmem:[%s8049_s16 + $0x68] sm:$0xff] %v6407_v33 }
 0x2f7   : > { %4924 = vst [vmem:[%s8049_s16 + $0x60] sm:$0xff] %v6408_v14  ;;  %v6294_v17 = vpop.f32.mrb[14].mxu1 }
 0x2f8   : > { %v6409_v32 = vadd.f32 %v6294_v17, %v8010_v1  ;;  %v4695_v36 = vpop.f32.mrb[15].mxu1 }
 0x2f9   : > { %v6410_v48 = vadd.f32 %v4695_v36, %v8012_v46 }
 0x2fa   : > { %4927 = vst [vmem:[%s8049_s16 + $0x78] sm:$0xff] %v6409_v32 }
 0x2fb   : > { %4926 = vst [vmem:[%s8049_s16 + $0x70] sm:$0xff] %v6410_v48  ;;  %v6297_v55 = vpop.f32.mrb[16].mxu1 }
 0x2fc   : > { %v6411_v6 = vadd.f32 %v6297_v55, %v8014_v8  ;;  %v4705_v11 = vpop.f32.mrb[17].mxu1 }
 0x2fd   : > { %v6412_v35 = vadd.f32 %v4705_v11, %v8016_v21 }
 0x2fe   : > { %4929 = vst [vmem:[%s8049_s16 + $0x88] sm:$0xff] %v6411_v6 }
 0x2ff   : > { %4928 = vst [vmem:[%s8049_s16 + $0x80] sm:$0xff] %v6412_v35  ;;  %v6300_v43 = vpop.f32.mrb[18].mxu1 }
 0x300   : > { %v6413_v60 = vadd.f32 %v6300_v43, %v8018_v38  ;;  %v4715_v56 = vpop.f32.mrb[19].mxu1 }
 0x301   : > { %v6414_v24 = vadd.f32 %v4715_v56, %v8020_v59 }
 0x302   : > { %4931 = vst [vmem:[%s8049_s16 + $0x98] sm:$0xff] %v6413_v60 }
 0x303   : > { %4930 = vst [vmem:[%s8049_s16 + $0x90] sm:$0xff] %v6414_v24  ;;  %v6303_v25 = vpop.f32.mrb[20].mxu1 }
 0x304   : > { %v6415_v9 = vadd.f32 %v6303_v25, %v8022_v41  ;;  %v4725_v10 = vpop.f32.mrb[21].mxu1 }
 0x305   : > { %v6416_v12 = vadd.f32 %v4725_v10, %v8024_v44 }
 0x306   : > { %4933 = vst [vmem:[%s8049_s16 + $0xa8] sm:$0xff] %v6415_v9 }
 0x307   : > { %4932 = vst [vmem:[%s8049_s16 + $0xa0] sm:$0xff] %v6416_v12  ;;  %v6306_v19 = vpop.f32.mrb[22].mxu1 }
 0x308   : > { %v6417_v22 = vadd.f32 %v6306_v19, %v8026_v58  ;;  %v4735_v1 = vpop.f32.mrb[23].mxu1 }
 0x309   : > { %v6418_v46 = vadd.f32 %v4735_v1, %v8028_v45 }
 0x30a   : > { %4935 = vst [vmem:[%s8049_s16 + $0xb8] sm:$0xff] %v6417_v22 }
 0x30b   : > { %4934 = vst [vmem:[%s8049_s16 + $0xb0] sm:$0xff] %v6418_v46  ;;  %v6309_v8 = vpop.f32.mrb[24].mxu1 }
 0x30c   : > { %v6419_v21 = vadd.f32 %v6309_v8, %v8030_v51  ;;  %v4745_v38 = vpop.f32.mrb[25].mxu1 }
 0x30d   : > { %v6420_v59 = vadd.f32 %v4745_v38, %v8032_v54 }
 0x30e   : > { %4937 = vst [vmem:[%s8049_s16 + $0xc8] sm:$0xff] %v6419_v21 }
 0x30f   : > { %4936 = vst [vmem:[%s8049_s16 + $0xc0] sm:$0xff] %v6420_v59  ;;  %v6312_v41 = vpop.f32.mrb[26].mxu1 }
 0x310   : > { %v6421_v44 = vadd.f32 %v6312_v41, %v8034_v53  ;;  %v4755_v58 = vpop.f32.mrb[27].mxu1 }
 0x311   : > { %v6422_v45 = vadd.f32 %v4755_v58, %v8036_v63 }
 0x312   : > { %4939 = vst [vmem:[%s8049_s16 + $0xd8] sm:$0xff] %v6421_v44 }
 0x313   : > { %4938 = vst [vmem:[%s8049_s16 + $0xd0] sm:$0xff] %v6422_v45  ;;  %v6315_v16 = vpop.f32.mrb[28].mxu1 }
 0x314   : > { %v6423_v51 = vadd.f32 %v6315_v16, %v8038_v31  ;;  %v4765_v28 = vpop.f32.mrb[29].mxu1 }
 0x315   : > { %v6424_v54 = vadd.f32 %v4765_v28, %v8040_v23 }
 0x316   : > { %4941 = vst [vmem:[%s8049_s16 + $0xe8] sm:$0xff] %v6423_v51 }
 0x317   : > { %4940 = vst [vmem:[%s8049_s16 + $0xe0] sm:$0xff] %v6424_v54  ;;  %v6318_v53 = vpop.f32.mrb[30].mxu1 }
 0x318   : > { %v6425_v29 = vadd.f32 %v6318_v53, %v8042_v57  ;;  %v4775_v63 = vpop.f32.mrb[31].mxu1 }
 0x319   : > { %v6426_v31 = vadd.f32 %v4775_v63, %v8044_v62 }
 0x31a   : > { %4943 = vst [vmem:[%s8049_s16 + $0xf8] sm:$0xff] %v6425_v29 }
 0x31b   : > { %4942 = vst [vmem:[%s8049_s16 + $0xf0] sm:$0xff] %v6426_v31 }
 0x31c   : > { %6722 = shalt.err (!%p6719_p5)
}
 0x31d   : > { %s6723_s12 = scalar_lea.hbm %s8103_s27, 4096  ;;  %s6727_s15 = scalar_lea.hbm %s8164_s6, 8192 }
 0x31e   : > { %p6724_p6 = scmp.ne.s32.totalorder %s8103_s27, %s6723_s12  ;;  %p6728_p10 = scmp.lt.u32.totalorder %s8103_s27, %s8164_s6 }
 0x31f   : > { %p6729_p11 = scmp.lt.u32.totalorder %s6727_s15, %s6723_s12  ;;  %p6731_p13 = scmp.lt.u32.totalorder %s6723_s12, %s8103_s27 }
 0x320   : > { %p6725_p7 = pnand %p6724_p6, %p6868_p4 }
 0x321   : > { %p6730_p12 = por %p6729_p11, %p6728_p10 }
 0x322   : > { %p6726_p9 = pneg %p6725_p7 }
 0x323   : > { %p6732_p0 = por %p6731_p13, %p6730_p12 }
 0x325   : > { %p6733_p1 = pnand %p6732_p0, %p6726_p9 }
 0x327   : > { %6736 = shalt.err (!%p6733_p1)
}
 0x328   : > { %s6791_s19 = smov 128   ;;  %s6792_s20 = smov 8  }
 0x329   : > { %6651 = dma.vmem_to_hbm [thread:$0]  (%p6868_p4), %s8105_s18, 4096, %s8103_s27, %s8112_s24, %s6791_s19, %s6791_s19, %s6792_s20  }
 0x32a PF: > { %p6657_p2 = scmp.ge.s32.totalorder %s6787_s26, 2  ;;  %s4976_s28 = sand.u32 1, %s6767_s21  }
 0x32b   : > { %s4977_s30 = scalar_lea.sflag [#allocation5], %s4976_s28 }
 0x32c   : > { %p6654_p3 = pnand %p6657_p2, %p6875_p8 }
 0x32e   : > { %6762 = dma.done.wait (!%p6654_p3), %s4977_s30, 4096  }
 0x32f   : > { %6764 = vsyncadd (!%p6654_p3), %s4977_s30, 4294963200  ;;  %s19_s26 = sadd.s32 1, %s6787_s26   ;;  %s8278_s21 = smov %s6771_s22 }
 0x330   : > { %p16_p5 = scmp.ge.s32.totalorder %s19_s26, 4   ;;  %s8279_s22 = smov %s6775_s23 }
 0x331   : > { %s8280_s23 = smov %s6881_s10  ;;  %s8281_s24 = smov %s6783_s25 }
 0x332   : > { %s8282_s25 = smov %s8284_s29  ;;  %18 = sbr.rel (!%p16_p5) target bundleno = 4 (0x4), region = 90 }
 0x339   :  { %4982 = vsyncpa [#allocation5], 1 }
 0x33a   :  { %4984 = vsyncpa [#allocation5 + $0x1], 1 }

</bundles_post_ra>
